<compile_context>
chip_gen: v6e
topology: v6e:2x2x1
jax: 0.10.0
libtpu: 0.0.40
codegen_flags: <defaults>
</compile_context>

<pallas_src>
import jax
import jax.numpy as jnp
from jax.experimental import pallas as pl
from jax.experimental.pallas import tpu as pltpu

_LANE = 128


# ------------------------------ fused Pallas kernel ------------------------------ #

def _make_fused_kernel(k, TH, W, Cm, Cout, g, add, has_halo,
                       cv1_concat, cv2_concat, out_group_store):
    """cv1 ((1,k) conv + folded BN + SiLU) -> cv2 ((k,1) grouped conv + folded BN +
    SiLU) (+ residual) for one (batch, H-tile) block, entirely in VMEM."""
    pad = k // 2
    Cmg, Coutg = Cm // g, Cout // g

    def kernel(*refs):
        if has_halo:
            x_ref, xt_ref, xb_ref, w1_ref, b1_ref, w2_ref, b2_ref, o_ref = refs
        else:
            x_ref, w1_ref, b1_ref, w2_ref, b2_ref, o_ref = refs

        xc = x_ref[0]                                    # (TH, W, Cin)
        Cin = xc.shape[-1]
        if has_halo:
            # Fold the halo rows into the SAME cv1 matmul (one MXU pass instead of
            # three); image-boundary handling is applied to y1 below.
            xs = jnp.concatenate([xt_ref[0], xc, xb_ref[0]], axis=0)  # (TH+2p, W, Cin)
        else:
            xs = xc
        R1 = xs.shape[0]

        # ----------------- cv1: (1,k) conv + folded BN + SiLU ----------------- #
        if pad > 0:
            # TODO(synk): replace with pltpu.roll along W (XLU) + a column mask to
            # avoid the sublane-misaligned padded copy (biggest win on v5e).
            zw = jnp.zeros((R1, pad, Cin), xs.dtype)
            xp = jnp.concatenate([zw, xs, zw], axis=1)   # 'same' zero-pad along W
            taps = [xp[:, dx:dx + W, :] for dx in range(k)]
        else:
            taps = [xs]

        if cv1_concat:                                    # lane-aligned Cin: 1 matmul
            xcat = taps[0] if k == 1 else jnp.concatenate(taps, axis=-1)  # (R1,W,k*Cin)
            y1 = jnp.einsum("rwc,cf->rwf", xcat, w1_ref[...],
                            preferred_element_type=jnp.float32)
        else:                                             # unaligned: accumulate taps
            w1 = w1_ref[...]                              # (k, Cin, Cm)
            y1 = jnp.einsum("rwc,cf->rwf", taps[0], w1[0],
                            preferred_element_type=jnp.float32)
            for dx in range(1, k):
                y1 = y1 + jnp.einsum("rwc,cf->rwf", taps[dx], w1[dx],
                                     preferred_element_type=jnp.float32)
        y1 = y1 + b1_ref[...]                             # (R1, W, Cm), f32
        y1 = y1 * jax.nn.sigmoid(y1)                      # SiLU

        # y1 rows outside the image are cv2's zero padding -> zero them.
        if has_halo:
            h = pl.program_id(1)
            last = pl.num_programs(1) - 1
            tmask = (h > 0).astype(jnp.float32)           # 0 only at the image top
            bmask = (h < last).astype(jnp.float32)        # 0 only at the image bottom
            rowmask = jnp.concatenate(
                [jnp.full((pad, W, 1), tmask, jnp.float32),
                 jnp.ones((TH, W, 1), jnp.float32),
                 jnp.full((pad, W, 1), bmask, jnp.float32)], axis=0)
            y1 = y1 * rowmask                             # fuses with the cast below
        elif pad > 0:                                     # single H tile: zero-pad rows
            zr = jnp.zeros((pad, W, Cm), y1.dtype)
            y1 = jnp.concatenate([zr, y1, zr], axis=0)

        y1 = y1.astype(w2_ref.dtype)                      # ONE hoisted cast for cv2

        # ------- cv2: (k,1) grouped conv + folded BN + SiLU (+ residual) -------- #
        b2 = b2_ref[...]                                  # (1, Cout)

        def group_matmul(gi):
            sl = y1 if g == 1 else y1[:, :, gi * Cmg:(gi + 1) * Cmg]
            if cv2_concat:                                # lane-aligned Cm/g: 1 matmul
                rows = [sl[dy:dy + TH] for dy in range(k)]
                ycat = rows[0] if k == 1 else jnp.concatenate(rows, axis=-1)
                return jnp.einsum("rwc,cf->rwf", ycat, w2_ref[gi],
                                  preferred_element_type=jnp.float32)
            # TODO(synk): on v7x prefer this accumulating form even for aligned
            # channels (MRB accumulates in place; no per-matmul drain cost).
            acc = jnp.einsum("rwc,cf->rwf", sl[0:TH], w2_ref[gi, 0],
                             preferred_element_type=jnp.float32)
            for dy in range(1, k):
                acc = acc + jnp.einsum("rwc,cf->rwf", sl[dy:dy + TH], w2_ref[gi, dy],
                                       preferred_element_type=jnp.float32)
            return acc

        def epilogue(y, c0, c1):                          # bias + SiLU (+ residual)
            yb = y + b2[:, c0:c1]
            yb = yb * jax.nn.sigmoid(yb)
            if add:
                # NOTE: with compute_dtype=bf16 the residual uses the bf16-cast x;
                # small precision drift vs the f32 reference (accepted).
                yb = yb + xc[:, :, c0:c1].astype(jnp.float32)
            return yb.astype(o_ref.dtype)

        if g == 1:
            o_ref[0] = epilogue(group_matmul(0), 0, Cout)
        elif out_group_store:                             # lane-aligned per-group stores
            for gi in range(g):
                o_ref[0, :, :, gi * Coutg:(gi + 1) * Coutg] = epilogue(
                    group_matmul(gi), gi * Coutg, (gi + 1) * Coutg)
        else:                                             # tiny Cout/g: one lane concat
            y2 = jnp.concatenate([group_matmul(gi) for gi in range(g)], axis=-1)
            o_ref[0] = epilogue(y2, 0, Cout)

    return kernel


# ------------------------------ tiling / VMEM sizing ------------------------------ #

def _choose_tile_h(H, W, Cin, Cm, Cout, k, itemsize, tile_h=None,
                   vmem_budget_bytes=20 << 20):
    """Largest H tile whose per-step working set fits the byte budget.
    Raise the budget on v6e (128 MiB physical VMEM); keep it modest on v7x (64 MiB).
    On v7x also prefer configs where B * (H // tile_h) is even so both TCs are busy."""
    pad = k // 2
    if tile_h is None:
        per_row = (2 * W * Cin * itemsize              # x block, double buffered
                   + 2 * W * Cout * itemsize           # out block, double buffered
                   + W * Cm * (4 + itemsize)           # f32 y1 + its cv2-dtype copy
                   + (k + 1) * W * Cin * itemsize      # W-padded x + window slices
                   + k * W * max(Cin, Cm) * itemsize)  # im2col / cv2 tap temporaries
        max_rows = max(8, int(vmem_budget_bytes // max(per_row, 1)))
        tile_h = H                                      # fallback: whole image, no halo
        if pad == 0 or H % pad == 0:
            for cand in range(min(H, max_rows), 0, -1):
                if H % cand == 0 and (pad == 0 or cand % pad == 0):
                    tile_h = cand
                    break
    if H % tile_h != 0:
        raise ValueError(f"H={H} must be divisible by tile_h={tile_h}")
    if tile_h < H and pad > 0 and (tile_h % pad != 0 or H % pad != 0):
        raise ValueError("tile_h and H must be multiples of k//2 when tiling H")
    return tile_h


def _vmem_limit_bytes(TH, W, Cin, Cm, Cout, k, itemsize, weight_bytes):
    pad = k // 2
    R1 = TH + 2 * pad
    est = (2 * R1 * W * Cin * itemsize                 # x (+halo) blocks, double buffered
           + 2 * TH * W * Cout * itemsize              # out block, double buffered
           + R1 * W * Cm * (4 + itemsize)              # f32 y1 + cast copy
           + R1 * (W + 2 * pad) * Cin * itemsize       # W-padded x copy
           + R1 * W * k * max(Cin, Cm) * itemsize      # tap / im2col temporaries
           + TH * W * k * Cm * itemsize                # cv2 im2col temporary
           + 2 * weight_bytes)
    # never below the compiler defaults (16/32 MiB); stay under v7x's 64 MiB physical
    return int(min(max(2 * est, 32 << 20), 56 << 20))


# ------------------------------ pallas_call wrapper ------------------------------ #

def cross_conv_pallas_nhwc(x_nhwc, params, tile_h=None, compute_dtype=None,
                           vmem_budget_bytes=20 << 20):
    """Fused CrossConv forward on NHWC input (fast path: no layout transposes)."""
    B, H, W, Cin = x_nhwc.shape
    k, g, add = params["k"], params["g"], params["add"]
    assert k % 2 == 1, "even k ('same' asymmetric padding) not supported"
    out_dtype = x_nhwc.dtype

    if compute_dtype is not None and x_nhwc.dtype != compute_dtype:
        x_nhwc = x_nhwc.astype(compute_dtype)   # e.g. bf16 on v6e/v7x; accum stays f32
    cdt = x_nhwc.dtype
    w1t, w2t = params["w1_taps"], params["w2_taps"]     # (k,Cin,Cm), (g,k,Cmg,Coutg)
    if w1t.dtype != cdt:                                # pre-cast via compute_dtype= in
        w1t = w1t.astype(cdt)                           # make_cross_conv_params to skip
    if w2t.dtype != cdt:
        w2t = w2t.astype(cdt)
    b1, b2 = params["b1_2d"], params["b2_2d"]           # kept f32

    Cm = w1t.shape[-1]
    Cout = b2.shape[-1]
    Cmg, Coutg = Cm // g, Cout // g
    pad = k // 2
    itemsize = jnp.dtype(cdt).itemsize

    TH = _choose_tile_h(H, W, Cin, Cm, Cout, k, itemsize, tile_h, vmem_budget_bytes)
    nH = H // TH
    has_halo = pad > 0 and nH > 1        # single-tile images skip the halo machinery

    cv1_concat = (k == 1) or (Cin % _LANE == 0)
    cv2_concat = (k == 1) or (Cmg % _LANE == 0)
    out_group_store = (g > 1) and (Coutg % _LANE == 0)

    w1_arg = w1t.reshape(k * Cin, Cm) if cv1_concat else w1t
    w2_arg = w2t.reshape(g, k * Cmg, Coutg) if cv2_concat else w2t

    in_specs = [pl.BlockSpec((1, TH, W, Cin), lambda b, h: (b, h, 0, 0))]
    args = [x_nhwc]
    if has_halo:
        thp = TH // pad          # tile height measured in pad-row halo blocks
        nhp = H // pad           # number of halo blocks along H
        in_specs += [
            # top halo: rows [h*TH - pad, h*TH); clamped at the image top (masked)
            pl.BlockSpec((1, pad, W, Cin),
                         lambda b, h: (b, jnp.maximum(h * thp - 1, 0), 0, 0)),
            # bottom halo: rows [h*TH + TH, h*TH + TH + pad); clamped at the bottom
            pl.BlockSpec((1, pad, W, Cin),
                         lambda b, h: (b, jnp.minimum((h + 1) * thp, nhp - 1), 0, 0)),
        ]
        args += [x_nhwc, x_nhwc]

    def _const_spec(arr):
        zeros = (0,) * arr.ndim
        return pl.BlockSpec(arr.shape, lambda b, h, _z=zeros: _z)

    in_specs += [_const_spec(w1_arg), _const_spec(b1),
                 _const_spec(w2_arg), _const_spec(b2)]
    args += [w1_arg, b1, w2_arg, b2]

    kernel = _make_fused_kernel(k, TH, W, Cm, Cout, g, add, has_halo,
                                cv1_concat, cv2_concat, out_group_store)

    weight_bytes = (w1_arg.size + w2_arg.size) * itemsize + (b1.size + b2.size) * 4
    vmem_limit = _vmem_limit_bytes(TH, W, Cin, Cm, Cout, k, itemsize, weight_bytes)

    return pl.pallas_call(
        kernel,
        out_shape=jax.ShapeDtypeStruct((B, H, W, Cout), out_dtype),
        grid=(B, nH),
        in_specs=in_specs,
        out_specs=pl.BlockSpec((1, TH, W, Cout), lambda b, h: (b, h, 0, 0)),
        compiler_params=pltpu.CompilerParams(
            dimension_semantics=("parallel", "parallel"),
            vmem_limit_bytes=vmem_limit),
    )(*args)


def cross_conv_forward(x_nchw, params, tile_h=None, compute_dtype=None):
    """PyTorch-facing API: NCHW in/out.  NOTE: the two transposes are full HBM
    read+write passes; keep the model NHWC end-to-end in production and call
    cross_conv_pallas_nhwc directly."""
    x_nhwc = jnp.transpose(x_nchw, (0, 2, 3, 1))
    y = cross_conv_pallas_nhwc(x_nhwc, params, tile_h=tile_h,
                               compute_dtype=compute_dtype)
    return jnp.transpose(y, (0, 3, 1, 2))


# --------------------------- parameter setup (JAX glue) -------------------------- #

def _init_conv_bn(key, cin, cout, kh, kw, g):
    """Deterministic Conv2d(bias=False) + BatchNorm2d params, BN folded (eval mode)."""
    k1, k2, k3, k4, k5 = jax.random.split(key, 5)
    w = 0.1 * jax.random.normal(k1, (cout, cin // g, kh, kw), jnp.float32)
    gamma = 1.0 + 0.1 * jax.random.normal(k2, (cout,), jnp.float32)
    beta = 0.1 * jax.random.normal(k3, (cout,), jnp.float32)
    run_mean = 0.1 * jax.random.normal(k4, (cout,), jnp.float32)
    run_var = 1.0 + 0.1 * jnp.abs(jax.random.normal(k5, (cout,), jnp.float32))
    eps = 1e-5
    scale = gamma / jnp.sqrt(run_var + eps)
    w_folded = w * scale[:, None, None, None]          # OIHW, BN folded in
    b_folded = beta - run_mean * scale
    return w_folded, b_folded


def make_cross_conv_params(key, ch_in, n_in, ch_out, n_out, k=3, s=1, g=1,
                           e=1.0, shortcut=False, compute_dtype=None):
    assert s == 1, "stride > 1 not implemented"  # TODO(synk)
    ch_ = int(ch_out * e)
    _n_ = int(n_out * e)   # custom Conv's n-arg; only gates the shortcut (see header)
    assert ch_ % g == 0 and ch_out % g == 0
    k1, k2 = jax.random.split(key)
    w1, b1 = _init_conv_bn(k1, ch_in, ch_, 1, k, 1)      # (1,k) conv
    w2, b2 = _init_conv_bn(k2, ch_, ch_out, k, 1, g)     # (k,1) grouped conv
    add = bool(shortcut) and (ch_in == ch_out) and (n_in == n_out)
    # tap-major weight layout used by the kernel:
    #   w1_taps[dx, c, f]      == w1_oihw[f, c, 0, dx]
    #   w2_taps[gi, dy, c, j]  == w2_oihw[gi*Coutg + j, c, dy, 0]
    w1_taps = jnp.transpose(w1[:, :, 0, :], (2, 1, 0))                  # (k, Cin, Cm)
    cmg, coutg = ch_ // g, ch_out // g
    w2_taps = jnp.transpose(w2[:, :, :, 0].reshape(g, coutg, cmg, k),
                            (0, 3, 2, 1))                               # (g,k,Cmg,Coutg)
    wd = compute_dtype if compute_dtype is not None else jnp.float32
    return {
        "k": k, "g": g, "add": add,
        "w1_oihw": w1, "b1": b1, "w2_oihw": w2, "b2": b2,     # for the JAX reference
        "w1_taps": w1_taps.astype(wd), "b1_2d": b1.reshape(1, -1),
        "w2_taps": w2_taps.astype(wd), "b2_2d": b2.reshape(1, -1),
    }


# ------------------------------- reference (plain JAX) --------------------------- #

def _ref_conv_bn_silu(x_nchw, w_oihw, bias, pad_hw, g):
    y = jax.lax.conv_general_dilated(
        x_nchw, w_oihw, window_strides=(1, 1),
        padding=(pad_hw[0], pad_hw[1]),
        dimension_numbers=("NCHW", "OIHW", "NCHW"),
        feature_group_count=g)
    y = y + bias[None, :, None, None]
    return y * jax.nn.sigmoid(y)


def cross_conv_reference(x_nchw, params):
    k, g = params["k"], params["g"]
    p = k // 2
    y = _ref_conv_bn_silu(x_nchw, params["w1_oihw"], params["b1"],
                          ((0, 0), (p, p)), 1)
    y = _ref_conv_bn_silu(y, params["w2_oihw"], params["b2"],
                          ((p, p), (0, 0)), g)
    return x_nchw + y if params["add"] else y


# ------------------------------------- main --------------------------------------- #

if __name__ == "__main__":
    key = jax.random.PRNGKey(0)
    kx, kp1, kp2, kp3, kx2 = jax.random.split(key, 5)

    B, C, H, W = 2, 4, 16, 16
    x = jax.random.normal(kx, (B, C, H, W), jnp.float32)

    # Config A: shortcut (ch_in == ch_out), g=1, tiny unaligned channels.
    #   tile_h=8  -> 2 H-tiles: exercises halo fetch + fused single-cv1 + row masking.
    #   default   -> 1 H-tile : exercises the no-halo (in-kernel H zero-pad) path.
    pA = make_cross_conv_params(kp1, ch_in=C, n_in=C, ch_out=C, n_out=C,
                                k=3, s=1, g=1, e=1.0, shortcut=True)
    refA = cross_conv_reference(x, pA)
    outA = jax.block_until_ready(cross_conv_forward(x, pA, tile_h=8))
    assert outA.shape == refA.shape == (B, C, H, W)
    assert jnp.allclose(outA, refA, atol=1e-3, rtol=1e-3), "config A (halo) mismatch"
    outA1 = jax.block_until_ready(cross_conv_forward(x, pA))       # TH = H, no halo
    assert jnp.allclose(outA1, refA, atol=1e-3, rtol=1e-3), "config A (1-tile) mismatch"

    # Config B: grouped cv2 (g=2), e=0.5, no shortcut, unaligned channels.
    pB = make_cross_conv_params(kp2, ch_in=C, n_in=C, ch_out=8, n_out=8,
                                k=3, s=1, g=2, e=0.5, shortcut=False)
    outB = jax.block_until_ready(cross_conv_forward(x, pB, tile_h=8))
    refB = cross_conv_reference(x, pB)
    assert outB.shape == refB.shape == (B, 8, H, W)
    assert jnp.allclose(outB, refB, atol=1e-3, rtol=1e-3), "config B mismatch"

    # Config C: lane-aligned channels (Cin=128, Cm=Cout=256, g=2) — exercises the
    # single-matmul im2col paths and the per-group lane-aligned direct stores.
    x2 = jax.random.normal(kx2, (1, 128, H, W), jnp.float32)
    pC = make_cross_conv_params(kp3, ch_in=128, n_in=128, ch_out=256, n_out=256,
                                k=3, s=1, g=2, e=1.0, shortcut=False)
    outC = jax.block_until_ready(cross_conv_forward(x2, pC, tile_h=8))
    refC = cross_conv_reference(x2, pC)
    assert outC.shape == refC.shape == (1, 256, H, W)
    # loose tolerance: MXU vs XLA-conv default f32 precision differences at K=384
    assert jnp.allclose(outC, refC, atol=5e-2, rtol=5e-2), "config C mismatch"

    print("KERNEL_OK")
</pallas_src>

<mosaic_0001>
module attributes {stable_mosaic.version = 11 : i64} {
  func.func @kernel(%arg0: i32, %arg1: i32, %arg2: memref<1x8x16x4xf32, #tpu.memory_space<vmem>>, %arg3: memref<1x1x16x4xf32, #tpu.memory_space<vmem>>, %arg4: memref<1x1x16x4xf32, #tpu.memory_space<vmem>>, %arg5: memref<3x4x4xf32, #tpu.memory_space<vmem>>, %arg6: memref<1x4xf32, #tpu.memory_space<vmem>>, %arg7: memref<1x3x4x4xf32, #tpu.memory_space<vmem>>, %arg8: memref<1x4xf32, #tpu.memory_space<vmem>>, %arg9: memref<1x8x16x4xf32, #tpu.memory_space<vmem>>) attributes {dimension_semantics = [#tpu.dimension_semantics<parallel>, #tpu.dimension_semantics<parallel>], iteration_bounds = array<i64: 2, 2>, scalar_prefetch = 0 : i64, scratch_operands = 0 : i64, tpu.core_type = #tpu.core_type<tc>, window_params = [{transform_indices = @transform_0, window_bounds = array<i64: 1, 8, 16, 4>}, {transform_indices = @transform_1, window_bounds = array<i64: 1, 1, 16, 4>}, {transform_indices = @transform_2, window_bounds = array<i64: 1, 1, 16, 4>}, {pipeline_mode = #tpu.pipeline_mode<synchronous>, transform_indices = @transform_3, window_bounds = array<i64: 3, 4, 4>}, {pipeline_mode = #tpu.pipeline_mode<synchronous>, transform_indices = @transform_4, window_bounds = array<i64: 1, 4>}, {pipeline_mode = #tpu.pipeline_mode<synchronous>, transform_indices = @transform_5, window_bounds = array<i64: 1, 3, 4, 4>}, {pipeline_mode = #tpu.pipeline_mode<synchronous>, transform_indices = @transform_6, window_bounds = array<i64: 1, 4>}, {transform_indices = @transform_7, window_bounds = array<i64: 1, 8, 16, 4>}]} {
    %c0 = arith.constant 0 : index
    %c0_0 = arith.constant 0 : index
    %c0_1 = arith.constant 0 : index
    %c0_2 = arith.constant 0 : index
    %0 = vector.load %arg2[%c0, %c0_0, %c0_1, %c0_2] : memref<1x8x16x4xf32, #tpu.memory_space<vmem>>, vector<1x8x16x4xf32>
    %1 = vector.shape_cast %0 : vector<1x8x16x4xf32> to vector<8x16x4xf32>
    %c0_3 = arith.constant 0 : index
    %c0_4 = arith.constant 0 : index
    %c0_5 = arith.constant 0 : index
    %c0_6 = arith.constant 0 : index
    %2 = vector.load %arg3[%c0_3, %c0_4, %c0_5, %c0_6] : memref<1x1x16x4xf32, #tpu.memory_space<vmem>>, vector<1x1x16x4xf32>
    %3 = vector.shape_cast %2 : vector<1x1x16x4xf32> to vector<1x16x4xf32>
    %c0_7 = arith.constant 0 : index
    %c0_8 = arith.constant 0 : index
    %c0_9 = arith.constant 0 : index
    %c0_10 = arith.constant 0 : index
    %4 = vector.load %arg4[%c0_7, %c0_8, %c0_9, %c0_10] : memref<1x1x16x4xf32, #tpu.memory_space<vmem>>, vector<1x1x16x4xf32>
    %5 = vector.shape_cast %4 : vector<1x1x16x4xf32> to vector<1x16x4xf32>
    %6 = tpu.concatenate %3, %1, %5 in 0 : vector<1x16x4xf32>, vector<8x16x4xf32>, vector<1x16x4xf32> -> vector<10x16x4xf32>
    %cst = arith.constant 0.000000e+00 : f32
    %7 = vector.broadcast %cst : f32 to vector<10x1x4xf32>
    %8 = tpu.concatenate %7, %6, %7 in 1 : vector<10x1x4xf32>, vector<10x16x4xf32>, vector<10x1x4xf32> -> vector<10x18x4xf32>
    %9 = vector.extract_strided_slice %8 {offsets = [0, 0, 0], sizes = [10, 16, 4], strides = [1, 1, 1]} : vector<10x18x4xf32> to vector<10x16x4xf32>
    %10 = vector.extract_strided_slice %8 {offsets = [0, 1, 0], sizes = [10, 16, 4], strides = [1, 1, 1]} : vector<10x18x4xf32> to vector<10x16x4xf32>
    %11 = vector.extract_strided_slice %8 {offsets = [0, 2, 0], sizes = [10, 16, 4], strides = [1, 1, 1]} : vector<10x18x4xf32> to vector<10x16x4xf32>
    %c0_11 = arith.constant 0 : index
    %c0_12 = arith.constant 0 : index
    %c0_13 = arith.constant 0 : index
    %12 = vector.load %arg5[%c0_11, %c0_12, %c0_13] : memref<3x4x4xf32, #tpu.memory_space<vmem>>, vector<3x4x4xf32>
    %13 = vector.extract_strided_slice %12 {offsets = [0, 0, 0], sizes = [1, 4, 4], strides = [1, 1, 1]} : vector<3x4x4xf32> to vector<1x4x4xf32>
    %14 = vector.shape_cast %13 : vector<1x4x4xf32> to vector<4x4xf32>
    "tpu.trace_start"() <{level = 10 : i32, message = "rwc,cf->rwf"}> : () -> ()
    %cst_14 = arith.constant dense<0.000000e+00> : vector<10x16x4xf32>
    %15 = tpu.matmul %9, %14, %cst_14 {dimension_numbers = #tpu.dot_dimension_numbers<[2], [0], [0, 1], [1], [0, 0, 0, 1, 1, 1], [], []>} : vector<10x16x4xf32>, vector<4x4xf32>, vector<10x16x4xf32> -> vector<10x16x4xf32>
    "tpu.trace_stop"() : () -> ()
    %16 = vector.extract_strided_slice %12 {offsets = [1, 0, 0], sizes = [1, 4, 4], strides = [1, 1, 1]} : vector<3x4x4xf32> to vector<1x4x4xf32>
    %17 = vector.shape_cast %16 : vector<1x4x4xf32> to vector<4x4xf32>
    "tpu.trace_start"() <{level = 10 : i32, message = "rwc,cf->rwf"}> : () -> ()
    %cst_15 = arith.constant dense<0.000000e+00> : vector<10x16x4xf32>
    %18 = tpu.matmul %10, %17, %cst_15 {dimension_numbers = #tpu.dot_dimension_numbers<[2], [0], [0, 1], [1], [0, 0, 0, 1, 1, 1], [], []>} : vector<10x16x4xf32>, vector<4x4xf32>, vector<10x16x4xf32> -> vector<10x16x4xf32>
    "tpu.trace_stop"() : () -> ()
    %19 = arith.addf %15, %18 : vector<10x16x4xf32>
    %20 = vector.extract_strided_slice %12 {offsets = [2, 0, 0], sizes = [1, 4, 4], strides = [1, 1, 1]} : vector<3x4x4xf32> to vector<1x4x4xf32>
    %21 = vector.shape_cast %20 : vector<1x4x4xf32> to vector<4x4xf32>
    "tpu.trace_start"() <{level = 10 : i32, message = "rwc,cf->rwf"}> : () -> ()
    %cst_16 = arith.constant dense<0.000000e+00> : vector<10x16x4xf32>
    %22 = tpu.matmul %11, %21, %cst_16 {dimension_numbers = #tpu.dot_dimension_numbers<[2], [0], [0, 1], [1], [0, 0, 0, 1, 1, 1], [], []>} : vector<10x16x4xf32>, vector<4x4xf32>, vector<10x16x4xf32> -> vector<10x16x4xf32>
    "tpu.trace_stop"() : () -> ()
    %23 = arith.addf %19, %22 : vector<10x16x4xf32>
    %c0_17 = arith.constant 0 : index
    %c0_18 = arith.constant 0 : index
    %24 = vector.load %arg6[%c0_17, %c0_18] : memref<1x4xf32, #tpu.memory_space<vmem>>, vector<1x4xf32>
    %25 = vector.shape_cast %24 : vector<1x4xf32> to vector<1x1x4xf32>
    %26 = vector.broadcast %25 : vector<1x1x4xf32> to vector<10x16x4xf32>
    %27 = arith.addf %23, %26 : vector<10x16x4xf32>
    %28 = arith.negf %27 : vector<10x16x4xf32>
    %29 = math.exp %28 : vector<10x16x4xf32>
    %cst_19 = arith.constant 1.000000e+00 : f32
    %30 = vector.broadcast %cst_19 : f32 to vector<10x16x4xf32>
    %31 = arith.addf %30, %29 : vector<10x16x4xf32>
    %32 = arith.divf %30, %31 : vector<10x16x4xf32>
    %33 = arith.mulf %27, %32 : vector<10x16x4xf32>
    %c0_i32 = arith.constant 0 : i32
    %34 = arith.cmpi sgt, %arg1, %c0_i32 : i32
    %35 = arith.extui %34 : i1 to i32
    %36 = arith.sitofp %35 : i32 to f32
    %c1_i32 = arith.constant 1 : i32
    %37 = arith.cmpi slt, %arg1, %c1_i32 : i32
    %38 = arith.extui %37 : i1 to i32
    %39 = arith.sitofp %38 : i32 to f32
    %40 = vector.broadcast %36 : f32 to vector<1x16x1xf32>
    %cst_20 = arith.constant 1.000000e+00 : f32
    %41 = vector.broadcast %cst_20 : f32 to vector<8x16x1xf32>
    %42 = vector.broadcast %39 : f32 to vector<1x16x1xf32>
    %43 = tpu.concatenate %40, %41, %42 in 0 : vector<1x16x1xf32>, vector<8x16x1xf32>, vector<1x16x1xf32> -> vector<10x16x1xf32>
    %44 = vector.broadcast %43 : vector<10x16x1xf32> to vector<10x16x4xf32>
    %45 = arith.mulf %33, %44 : vector<10x16x4xf32>
    %c0_21 = arith.constant 0 : index
    %c0_22 = arith.constant 0 : index
    %46 = vector.load %arg8[%c0_21, %c0_22] : memref<1x4xf32, #tpu.memory_space<vmem>>, vector<1x4xf32>
    %47 = vector.extract_strided_slice %45 {offsets = [0, 0, 0], sizes = [8, 16, 4], strides = [1, 1, 1]} : vector<10x16x4xf32> to vector<8x16x4xf32>
    %c0_23 = arith.constant 0 : index
    %c0_24 = arith.constant 0 : index
    %c0_25 = arith.constant 0 : index
    %c0_26 = arith.constant 0 : index
    %48 = vector.load %arg7[%c0_23, %c0_24, %c0_25, %c0_26] : memref<1x3x4x4xf32, #tpu.memory_space<vmem>>, vector<1x1x4x4xf32>
    %49 = vector.shape_cast %48 : vector<1x1x4x4xf32> to vector<4x4xf32>
    "tpu.trace_start"() <{level = 10 : i32, message = "rwc,cf->rwf"}> : () -> ()
    %cst_27 = arith.constant dense<0.000000e+00> : vector<8x16x4xf32>
    %50 = tpu.matmul %47, %49, %cst_27 {dimension_numbers = #tpu.dot_dimension_numbers<[2], [0], [0, 1], [1], [0, 0, 0, 1, 1, 1], [], []>} : vector<8x16x4xf32>, vector<4x4xf32>, vector<8x16x4xf32> -> vector<8x16x4xf32>
    "tpu.trace_stop"() : () -> ()
    %51 = vector.extract_strided_slice %45 {offsets = [1, 0, 0], sizes = [8, 16, 4], strides = [1, 1, 1]} : vector<10x16x4xf32> to vector<8x16x4xf32>
    %c0_28 = arith.constant 0 : index
    %c1 = arith.constant 1 : index
    %c0_29 = arith.constant 0 : index
    %c0_30 = arith.constant 0 : index
    %52 = vector.load %arg7[%c0_28, %c1, %c0_29, %c0_30] : memref<1x3x4x4xf32, #tpu.memory_space<vmem>>, vector<1x1x4x4xf32>
    %53 = vector.shape_cast %52 : vector<1x1x4x4xf32> to vector<4x4xf32>
    "tpu.trace_start"() <{level = 10 : i32, message = "rwc,cf->rwf"}> : () -> ()
    %cst_31 = arith.constant dense<0.000000e+00> : vector<8x16x4xf32>
    %54 = tpu.matmul %51, %53, %cst_31 {dimension_numbers = #tpu.dot_dimension_numbers<[2], [0], [0, 1], [1], [0, 0, 0, 1, 1, 1], [], []>} : vector<8x16x4xf32>, vector<4x4xf32>, vector<8x16x4xf32> -> vector<8x16x4xf32>
    "tpu.trace_stop"() : () -> ()
    %55 = arith.addf %50, %54 : vector<8x16x4xf32>
    %56 = vector.extract_strided_slice %45 {offsets = [2, 0, 0], sizes = [8, 16, 4], strides = [1, 1, 1]} : vector<10x16x4xf32> to vector<8x16x4xf32>
    %c0_32 = arith.constant 0 : index
    %c2 = arith.constant 2 : index
    %c0_33 = arith.constant 0 : index
    %c0_34 = arith.constant 0 : index
    %57 = vector.load %arg7[%c0_32, %c2, %c0_33, %c0_34] : memref<1x3x4x4xf32, #tpu.memory_space<vmem>>, vector<1x1x4x4xf32>
    %58 = vector.shape_cast %57 : vector<1x1x4x4xf32> to vector<4x4xf32>
    "tpu.trace_start"() <{level = 10 : i32, message = "rwc,cf->rwf"}> : () -> ()
    %cst_35 = arith.constant dense<0.000000e+00> : vector<8x16x4xf32>
    %59 = tpu.matmul %56, %58, %cst_35 {dimension_numbers = #tpu.dot_dimension_numbers<[2], [0], [0, 1], [1], [0, 0, 0, 1, 1, 1], [], []>} : vector<8x16x4xf32>, vector<4x4xf32>, vector<8x16x4xf32> -> vector<8x16x4xf32>
    "tpu.trace_stop"() : () -> ()
    %60 = arith.addf %55, %59 : vector<8x16x4xf32>
    %61 = vector.shape_cast %46 : vector<1x4xf32> to vector<1x1x4xf32>
    %62 = vector.broadcast %61 : vector<1x1x4xf32> to vector<8x16x4xf32>
    %63 = arith.addf %60, %62 : vector<8x16x4xf32>
    %64 = arith.negf %63 : vector<8x16x4xf32>
    %65 = math.exp %64 : vector<8x16x4xf32>
    %cst_36 = arith.constant 1.000000e+00 : f32
    %66 = vector.broadcast %cst_36 : f32 to vector<8x16x4xf32>
    %67 = arith.addf %66, %65 : vector<8x16x4xf32>
    %68 = arith.divf %66, %67 : vector<8x16x4xf32>
    %69 = arith.mulf %63, %68 : vector<8x16x4xf32>
    %70 = arith.addf %69, %1 : vector<8x16x4xf32>
    %c0_37 = arith.constant 0 : index
    %c0_38 = arith.constant 0 : index
    %c0_39 = arith.constant 0 : index
    %c0_40 = arith.constant 0 : index
    %71 = vector.load %arg9[%c0_37, %c0_38, %c0_39, %c0_40] : memref<1x8x16x4xf32, #tpu.memory_space<vmem>>, vector<1x8x16x4xf32>
    %72 = vector.shape_cast %71 : vector<1x8x16x4xf32> to vector<8x16x4xf32>
    %73 = vector.shape_cast %70 : vector<8x16x4xf32> to vector<1x8x16x4xf32>
    tpu.vector_store %arg9[%c0_37, %c0_38, %c0_39, %c0_40], %73 {strides = array<i32>} : memref<1x8x16x4xf32, #tpu.memory_space<vmem>>, vector<1x8x16x4xf32>,
    return
  }
  func.func @transform_0(%arg0: i32, %arg1: i32) -> (i32, i32, i32, i32) {
    %c0_i32 = arith.constant 0 : i32
    %c0_i32_0 = arith.constant 0 : i32
    %c0_i32_1 = arith.constant 0 : i32
    return %arg0, %arg1, %c0_i32, %c0_i32_0 : i32, i32, i32, i32
  }
  func.func @transform_1(%arg0: i32, %arg1: i32) -> (i32, i32, i32, i32) {
    %c8_i32 = arith.constant 8 : i32
    %0 = arith.muli %arg1, %c8_i32 : i32
    %c1_i32 = arith.constant 1 : i32
    %1 = arith.subi %0, %c1_i32 : i32
    %c0_i32 = arith.constant 0 : i32
    %2 = arith.maxsi %1, %c0_i32 : i32
    %c0_i32_0 = arith.constant 0 : i32
    %c0_i32_1 = arith.constant 0 : i32
    %c0_i32_2 = arith.constant 0 : i32
    return %arg0, %2, %c0_i32_0, %c0_i32_1 : i32, i32, i32, i32
  }
  func.func @transform_2(%arg0: i32, %arg1: i32) -> (i32, i32, i32, i32) {
    %c1_i32 = arith.constant 1 : i32
    %0 = arith.addi %arg1, %c1_i32 : i32
    %c8_i32 = arith.constant 8 : i32
    %1 = arith.muli %0, %c8_i32 : i32
    %c15_i32 = arith.constant 15 : i32
    %2 = arith.minsi %1, %c15_i32 : i32
    %c0_i32 = arith.constant 0 : i32
    %c0_i32_0 = arith.constant 0 : i32
    %c0_i32_1 = arith.constant 0 : i32
    return %arg0, %2, %c0_i32, %c0_i32_0 : i32, i32, i32, i32
  }
  func.func @transform_3(%arg0: i32, %arg1: i32) -> (i32, i32, i32) {
    %c0_i32 = arith.constant 0 : i32
    %c0_i32_0 = arith.constant 0 : i32
    %c0_i32_1 = arith.constant 0 : i32
    %c0_i32_2 = arith.constant 0 : i32
    return %c0_i32, %c0_i32_0, %c0_i32_1 : i32, i32, i32
  }
  func.func @transform_4(%arg0: i32, %arg1: i32) -> (i32, i32) {
    %c0_i32 = arith.constant 0 : i32
    %c0_i32_0 = arith.constant 0 : i32
    %c0_i32_1 = arith.constant 0 : i32
    return %c0_i32, %c0_i32_0 : i32, i32
  }
  func.func @transform_5(%arg0: i32, %arg1: i32) -> (i32, i32, i32, i32) {
    %c0_i32 = arith.constant 0 : i32
    %c0_i32_0 = arith.constant 0 : i32
    %c0_i32_1 = arith.constant 0 : i32
    %c0_i32_2 = arith.constant 0 : i32
    %c0_i32_3 = arith.constant 0 : i32
    return %c0_i32, %c0_i32_0, %c0_i32_1, %c0_i32_2 : i32, i32, i32, i32
  }
  func.func @transform_6(%arg0: i32, %arg1: i32) -> (i32, i32) {
    %c0_i32 = arith.constant 0 : i32
    %c0_i32_0 = arith.constant 0 : i32
    %c0_i32_1 = arith.constant 0 : i32
    return %c0_i32, %c0_i32_0 : i32, i32
  }
  func.func @transform_7(%arg0: i32, %arg1: i32) -> (i32, i32, i32, i32) {
    %c0_i32 = arith.constant 0 : i32
    %c0_i32_0 = arith.constant 0 : i32
    %c0_i32_1 = arith.constant 0 : i32
    return %arg0, %arg1, %c0_i32, %c0_i32_0 : i32, i32, i32, i32
  }
}

</mosaic_0001>

<bundles_post_ra>
// kernel: tpu_custom_call.1
= control target key start
LH: loop header
LB: loop body
LE: loop exit
PB: predicated region body
PF: predicated region fallthrough
CT: control target
= control target key end

     0   :  { %s3145_s24 = smov 0   ;;  %s3147_s25 = smov 0   ;;  %s3973_s0 = inlined_call_operand.vmem [shape: f32[2,16,16,4], index: 0, kind: input, shape index: {}]   ;;  %s3974_s1 = inlined_call_operand.vmem [shape: f32[2,16,16,4], index: 1, kind: input, shape index: {}]   ;;  %s3975_s2 = inlined_call_operand.vmem [shape: f32[2,16,16,4], index: 2, kind: input, shape index: {}]   ;;  %s3976_s3 = inlined_call_operand.vmem [shape: f32[3,4,4], index: 3, kind: input, shape index: {}]   ;;  %s3977_s4 = inlined_call_operand.vmem [shape: f32[1,4], index: 4, kind: input, shape index: {}]   ;;  %s3978_s5 = inlined_call_operand.vmem [shape: f32[1,3,4,4], index: 5, kind: input, shape index: {}]   ;;  %s3979_s6 = inlined_call_operand.vmem [shape: f32[1,4], index: 6, kind: input, shape index: {}]   ;;  %s3980_s7 = inlined_call_operand.vmem [shape: f32[2,16,16,4], index: 7, kind: output, shape index: {}]  }
   0x1   :  { %s3149_s26 = smov 0   ;;  %s3151_s27 = smov 0  }
   0x2   :  { %s3153_s28 = smov 0  }
   0x3 LB: > { %s26_s29 = sadd.s32 1, %s3094_s26  ;;  %s29_s30 = sadd.s32 1, %s3098_s27  ;;  %s3102_s28 = sphi %s3153_s28, %s17_s28   ;;  %s3098_s27 = sphi %s3151_s27, %s3985_s27   ;;  %s3094_s26 = sphi %s3149_s26, %s3984_s26   ;;  %s3090_s25 = sphi %s3147_s25, %s3983_s25   ;;  %s3086_s24 = sphi %s3145_s24, %s3982_s24  }
   0x4   : > { %p27_p0 = scmp.ge.s32.totalorder %s26_s29, 2  ;;  %p2382_p1 = scmp.ge.s32.totalorder %s3102_s28, 1 }
   0x5   : > { %p323_p2 = scmp.lt.s32.totalorder %s3102_s28, 5 }
   0x6   : > { %s3987_s29 = smov (%p27_p0, %s26_s29), 0  ;;  %s3989_s30 = smov (!%p27_p0, %s29_s30), %s3098_s27 }
   0x7   : > { %p324_p3 = pnand %p2382_p1, %p323_p2  ;;  %p31_p4 = scmp.ge.s32.totalorder %s3989_s30, 2 }
   0x8   : > { %s3181_s10 = sshll.u32 (!%p324_p3), %s3086_s24, 3  ;;  %p392_p5 = scmp.lt.s32.totalorder (!%p324_p3), %s3090_s25, 1 }
   0x9   : > { %s3991_s30 = smov (%p31_p4, %s3989_s30), 0  ;;  %327 = sbr.rel (%p324_p3) target bundleno = 610 (0x262), region = 48 }
   0xa   : > { %p394_p6 = scmp.lt.s32.totalorder (!%p324_p3), %s3181_s10, 15  ;;  %s3187_s11 = sadd.s32 (!%p324_p3), 4294967295, %s3181_s10 }
   0xb   : > { %p404_p7 = scmp.gt.s32.totalorder (!%p324_p3), %s3187_s11, 0  ;;  %p2389_p8 = scmp.lt.s32.totalorder (!%p324_p3), %s3187_s11, 15 }
   0xc   : > { %s2571_s20 = sadd.s32 (!%p324_p3), 8, %s3181_s10  ;;  %p1496_p10 = scmp.gt.s32.totalorder (!%p324_p3), %s3086_s24, 0 }
   0xd   : > { %p3215_p9 = scmp.lt.s32.totalorder (!%p324_p3), %s2571_s20, 15  ;;  %p1499_p11 = scmp.lt.s32.totalorder (!%p324_p3), %s3086_s24, 1 }
   0xe   : > { %v559_v0 = vld [vmem:[%s3976_s3 + $0x4] sm:$0xf]  ;;  %vm673_vm0 = vcmask 1043456   ;;  %v3192_v1 = vld [vmem:[%s3976_s3 + $0x8] sm:$0xf]  ;;  %s3993_s25 = smov (!%p392_p5, %s3090_s25), 1 }
   0xf   : > { %2686 = vmatprep.subr.msk.mxu0 %vm673_vm0, %v559_v0  ;;  %2860 = vmatprep.subr.msk.mxu1 %vm673_vm0, %v559_v0  ;;  %v3199_v2 = vld [vmem:[%s3976_s3] sm:$0xf]  ;;  %s395_s16 = scalar_select %p394_p6, %s3181_s10, 15  ;;  %v3104_v3 = vmov 0   ;;  %vm487_vm1 = vcmask 1040384   ;;  %vm581_vm2 = vcmask 1046528  }
  0x10   : > { %2687 = vmatpush3.msk.msra.mxu0 %vm673_vm0, %v559_v0  ;;  %2861 = vmatpush3.msk.msra.mxu1 %vm673_vm0, %v559_v0  ;;  %s3206_s17 = sshll.u32 %s3993_s25, 5  ;;  %s3995_s20 = smov (!%p3215_p9, %s2571_s20), 15  ;;  %vm632_vm3 = vcmask 31744   ;;  %vm1050_vm4 = vcmask 1045504  }
  0x11   : > { %2750 = vmatprep.subr.msk.mxu0 %vm673_vm0, %v3192_v1  ;;  %2718 = vmatprep.subr.msk.mxu1 %vm673_vm0, %v3199_v2  ;;  %s2384_s18 = sshll.u32 %s395_s16, 1  ;;  %s3999_s20 = smov (!%p3215_p9, %s3995_s20), 15 }
  0x12   : > { %2903 = vset.pattern.permute.xlu0 %v3104_v3  ;;  %s3211_s19 = sadd.s32 %s3206_s17, %s2384_s18  ;;  %s2401_s13 = sshll.u32 %s3999_s20, 1 }
  0x13   : > { %s2386_s21 = sshll.u32 %s3211_s19, 3  ;;  %s429_s14 = sadd.s32 %s2401_s13, %s3206_s17 }
  0x14   : > { %s3224_s8 = scalar_lea.vmem %s3973_s0, %s2386_s21  ;;  %s2403_s20 = sshll.u32 %s429_s14, 3 }
  0x15   : > { %s405_s9 = scalar_select %p404_p7, %s3187_s11, 0  ;;  %v447_v4 = vld [vmem:[%s3224_s8] sm:$0xff]  ;;  %v448_v5 = vld [vmem:[%s3224_s8 + $0x8] sm:$0xff]  ;;  %v449_v6 = vld [vmem:[%s3224_s8 + $0x10] sm:$0xff] }
  0x16   : > { %v491_v7 = vrot.slane %v447_v4, 7  ;;  %v492_v8 = vrot.slane %v448_v5, 7  ;;  %v450_v9 = vld [vmem:[%s3224_s8 + $0x18] sm:$0xff]  ;;  %v494_v10 = vrot.slane %v449_v6, 7  ;;  %v451_v14 = vld [vmem:[%s3224_s8 + $0x20] sm:$0xff]  ;;  %v452_v20 = vld [vmem:[%s3224_s8 + $0x28] sm:$0xff]  ;;  %s431_s23 = scalar_lea.vmem %s3975_s2, %s2403_s20 }
  0x17   : > { %s3997_s9 = smov (!%p2389_p8, %s405_s9), 15  ;;  %v495_v11 = vrot.slane %v450_v9, 7  ;;  %v497_v21 = vrot.slane %v451_v14, 7  ;;  %v465_v28 = vld [vmem:[%s431_s23] sm:$0xff]  ;;  %v466_v29 = vld [vmem:[%s431_s23 + $0x8] sm:$0xff]  ;;  %v498_v31 = vrot.slane %v452_v20, 7 }
  0x18   : > { %v3238_v12 = vsel %vm487_vm1, %v491_v7, %v492_v8  ;;  %v3241_v13 = vsel %vm487_vm1, 0.0, %v491_v7  ;;  %s2394_s10 = sshll.u32 %s3997_s9, 1  ;;  %v3246_v15 = vsel %vm487_vm1, %v492_v8, 0.0  ;;  %v3249_v16 = vsel %vm487_vm1, 0.0, %v494_v10  ;;  %v453_v40 = vld [vmem:[%s3224_s8 + $0x30] sm:$0xff]  ;;  %v454_v41 = vld [vmem:[%s3224_s8 + $0x38] sm:$0xff] }
  0x19   : > { %s412_s12 = sadd.s32 %s2394_s10, %s3206_s17  ;;  %v587_v17 = vrot.slane %v3241_v13, 1  ;;  %v588_v18 = vrot.slane %v3238_v12, 1  ;;  %v3255_v19 = vsel %vm487_vm1, %v494_v10, %v495_v11  ;;  %v590_v24 = vrot.slane %v3246_v15, 1  ;;  %v455_v57 = vld [vmem:[%s3224_s8 + $0x40] sm:$0xff]  ;;  %v456_v58 = vld [vmem:[%s3224_s8 + $0x48] sm:$0xff]  ;;  %v458_v9 = vld [vmem:[%s3224_s8 + $0x58] sm:$0xff] }
  0x1a   : > { %s2396_s11 = sshll.u32 %s412_s12, 3  ;;  %v592_v25 = vrot.slane %v3249_v16, 1  ;;  %v593_v30 = vrot.slane %v3255_v19, 1  ;;  %v515_v32 = vrot.slane %v465_v28, 7  ;;  %v516_v33 = vrot.slane %v466_v29, 7 }
  0x1b   : > { %s414_s18 = scalar_lea.vmem %s3974_s1, %s2396_s11  ;;  %v589_v34 = vsel %vm581_vm2, %v587_v17, %v588_v18  ;;  %v3269_v35 = vsel %vm487_vm1, %v495_v11, 0.0  ;;  %v3281_v39 = vsel %vm487_vm1, 0.0, %v497_v21  ;;  %v3297_v49 = vsel %vm487_vm1, %v497_v21, %v498_v31 }
  0x1c   : > { %v463_v22 = vld [vmem:[%s414_s18] sm:$0xff]  ;;  %v464_v23 = vld [vmem:[%s414_s18 + $0x8] sm:$0xff]  ;;  %v3288_v44 = vsel %vm487_vm1, %v515_v32, %v516_v33  ;;  %v3291_v45 = vsel %vm487_vm1, 0.0, %v515_v32  ;;  %v3301_v51 = vsel %vm487_vm1, %v516_v33, 0.0  ;;  %v500_v52 = vrot.slane %v453_v40, 7  ;;  %v461_v40 = vld [vmem:[%s3224_s8 + $0x70] sm:$0xff] }
  0x1d   : > { %v488_v26 = vrot.slane %v463_v22, 7  ;;  %v489_v27 = vrot.slane %v464_v23, 7  ;;  %v627_v46 = vrot.slane %v3291_v45, 1  ;;  %v628_v47 = vrot.slane %v3288_v44, 1  ;;  %v459_v23 = vld [vmem:[%s3224_s8 + $0x60] sm:$0xff] }
  0x1e   : > { %v501_v53 = vrot.slane %v454_v41, 7  ;;  %v630_v56 = vrot.slane %v3301_v51, 1  ;;  %v591_v59 = vsel %vm581_vm2, %v588_v18, %v590_v24  ;;  %v594_v60 = vsel %vm581_vm2, %v592_v25, %v593_v30  ;;  %v460_v24 = vld [vmem:[%s3224_s8 + $0x68] sm:$0xff]  ;;  %s3402_s25 = scalar_select %p1496_p10, 1, 0 }
  0x1f   : > { %v3272_v36 = vsel %vm487_vm1, %v488_v26, %v489_v27  ;;  %v3275_v37 = vsel %vm487_vm1, 0.0, %v488_v26  ;;  %v3278_v38 = vsel %vm487_vm1, %v489_v27, 0.0  ;;  %v629_v54 = vsel %vm581_vm2, %v627_v46, %v628_v47  ;;  %s3410_s9 = scalar_select %p1499_p11, 1, 0 }
  0x20   : > { %v582_v42 = vrot.slane %v3275_v37, 1  ;;  %v583_v43 = vrot.slane %v3272_v36, 1  ;;  %v585_v48 = vrot.slane %v3278_v38, 1  ;;  %2715 = vmatprep.mubr.msk.f32.mxu1 %vm632_vm3, %v629_v54  ;;  %v595_v61 = vrot.slane %v3269_v35, 1  ;;  %s1498_s24 = scvt.s32.f32 %s3402_s25 }
  0x21   : > { %v631_v62 = vsel %vm581_vm2, %v628_v47, %v630_v56  ;;  %v597_v63 = vrot.slane %v3281_v39, 1  ;;  %v598_v0 = vrot.slane %v3297_v49, 1  ;;  %v3321_v3 = vsel %vm487_vm1, %v498_v31, 0.0  ;;  %s1501_s10 = scvt.s32.f32 %s3410_s9  ;;  %s3893_s9 = scalar_lea.vmem %s3980_s7, %s2386_s21 }
  0x22   : > { %v584_v50 = vsel %vm581_vm2, %v582_v42, %v583_v43  ;;  %v586_v55 = vsel %vm581_vm2, %v583_v43, %v585_v48  ;;  %2716 = vmatmul.mubr.msk.f32.vlgmr.msra.gmra.mxu1 %vm632_vm3, %v631_v62  ;;  %v3325_v4 = vsel %vm487_vm1, %v500_v52, %v501_v53  ;;  %v3328_v5 = vsel %vm487_vm1, 0.0, %v500_v52  ;;  %v462_v42 = vld [vmem:[%s3224_s8 + $0x78] sm:$0xff] }
  0x23   : > { %2688 = vmatprep.mubr.msk.f32.mxu0 %vm632_vm3, %v584_v50  ;;  %v503_v6 = vrot.slane %v455_v57, 7  ;;  %v504_v7 = vrot.slane %v456_v58, 7  ;;  %2719 = vmatpush3.msk.msra.mxu1 %vm673_vm0, %v3199_v2  ;;  %v596_v8 = vsel %vm581_vm2, %v593_v30, %v595_v61  ;;  %v600_v10 = vrot.slane %v3321_v3, 1 }
  0x24   : > { %2689 = vmatmul.mubr.msk.f32.vlgmr.msra.gmra.mxu0 %vm632_vm3, %v586_v55  ;;  %2720 = vmatprep.mubr.msk.f32.mxu1 %vm632_vm3, %v3275_v37  ;;  %v602_v11 = vrot.slane %v3328_v5, 1  ;;  %v603_v14 = vrot.slane %v3325_v4, 1  ;;  %v3343_v2 = vsel %vm487_vm1, %v501_v53, 0.0  ;;  %v599_v17 = vsel %vm581_vm2, %v597_v63, %v598_v0 }
  0x25   : > { %2751 = vmatpush3.msk.msra.mxu0 %vm673_vm0, %v3192_v1  ;;  %2691 = vmatprep.mubr.msk.f32.mxu0 %vm632_vm3, %v589_v34  ;;  %v457_v1 = vld [vmem:[%s3224_s8 + $0x50] sm:$0xff]  ;;  %v3349_v18 = vsel %vm487_vm1, %v503_v6, %v504_v7  ;;  %v3352_v20 = vsel %vm487_vm1, 0.0, %v503_v6  ;;  %v507_v22 = vrot.slane %v458_v9, 7  ;;  %v605_v25 = vrot.slane %v3343_v2, 1 }
  0x26   : > { %2721 = vmatmul.mubr.msk.f32.vlgmr.msra.gmra.mxu1 %vm632_vm3, %v3272_v36  ;;  %v506_v21 = vrot.slane %v457_v1, 7  ;;  %v601_v26 = vsel %vm581_vm2, %v598_v0, %v600_v10  ;;  %v604_v27 = vsel %vm581_vm2, %v602_v11, %v603_v14  ;;  %v607_v28 = vrot.slane %v3352_v20, 1 }
  0x27   : > { %2723 = vmatprep.mubr.msk.f32.mxu1 %vm632_vm3, %v3241_v13  ;;  %v608_v29 = vrot.slane %v3349_v18, 1  ;;  %v3368_v30 = vsel %vm487_vm1, %v504_v7, 0.0  ;;  %v509_v32 = vrot.slane %v459_v23, 7  ;;  %v510_v33 = vrot.slane %v460_v24, 7 }
  0x28   : > { %2692 = vmatmul.mubr.msk.f32.gmra.mxu0 %vm632_vm3, %v591_v59  ;;  %v3371_v31 = vsel %vm487_vm1, 0.0, %v506_v21  ;;  %v3377_v34 = vsel %vm487_vm1, %v506_v21, %v507_v22  ;;  %v606_v41 = vsel %vm581_vm2, %v603_v14, %v605_v25  ;;  %v610_v46 = vrot.slane %v3368_v30, 1 }
  0x29   : > { %2694 = vmatprep.mubr.msk.f32.mxu0 %vm632_vm3, %v594_v60  ;;  %v609_v43 = vsel %vm581_vm2, %v607_v28, %v608_v29  ;;  %v612_v47 = vrot.slane %v3371_v31, 1  ;;  %v3389_v48 = vsel %vm487_vm1, %v507_v22, 0.0  ;;  %v613_v50 = vrot.slane %v3377_v34, 1 }
  0x2a   : > { %2724 = vmatmul.mubr.msk.f32.gmra.mxu1 %vm632_vm3, %v3238_v12  ;;  %v3395_v52 = vsel %vm487_vm1, %v509_v32, %v510_v33  ;;  %v3398_v53 = vsel %vm487_vm1, 0.0, %v509_v32  ;;  %v512_v54 = vrot.slane %v461_v40, 7  ;;  %v513_v55 = vrot.slane %v462_v42, 7 }
  0x2b   : > { %2726 = vmatprep.mubr.msk.f32.mxu1 %vm632_vm3, %v3249_v16  ;;  %v615_v56 = vrot.slane %v3389_v48, 1  ;;  %v611_v57 = vsel %vm581_vm2, %v608_v29, %v610_v46  ;;  %v617_v58 = vrot.slane %v3398_v53, 1  ;;  %v618_v59 = vrot.slane %v3395_v52, 1 }
  0x2c   : > { %2695 = vmatmul.mubr.msk.f32.gmra.mxu0 %vm632_vm3, %v596_v8  ;;  %v3417_v60 = vsel %vm487_vm1, %v510_v33, 0.0  ;;  %v614_v61 = vsel %vm581_vm2, %v612_v47, %v613_v50  ;;  %v3423_v62 = vsel %vm487_vm1, 0.0, %v512_v54  ;;  %v3429_v63 = vsel %vm487_vm1, %v512_v54, %v513_v55 }
  0x2d   : > { %2697 = vmatprep.mubr.msk.f32.mxu0 %vm632_vm3, %v599_v17  ;;  %v616_v0 = vsel %vm581_vm2, %v613_v50, %v615_v56  ;;  %v620_v6 = vrot.slane %v3417_v60, 1  ;;  %v619_v7 = vsel %vm581_vm2, %v617_v58, %v618_v59  ;;  %v622_v1 = vrot.slane %v3423_v62, 1 }
  0x2e   : > { %2727 = vmatmul.mubr.msk.f32.gmra.mxu1 %vm632_vm3, %v3255_v19  ;;  %v1096_v8 = vrot.slane %v3291_v45, 2  ;;  %v1097_v9 = vrot.slane %v3288_v44, 2  ;;  %v623_v10 = vrot.slane %v3429_v63, 1  ;;  %v3444_v11 = vsel %vm487_vm1, %v513_v55, 0.0 }
  0x2f   : > { %2729 = vmatprep.mubr.msk.f32.mxu1 %vm632_vm3, %v3281_v39  ;;  %v1099_v14 = vrot.slane %v3301_v51, 2  ;;  %v1502_v17 = vstv %s1498_s24  ;;  %v1503_v23 = vstv %s1501_s10  ;;  %v621_v24 = vsel %vm581_vm2, %v618_v59, %v620_v6 }
  0x30   : > { %2698 = vmatmul.mubr.msk.f32.gmra.mxu0 %vm632_vm3, %v601_v26  ;;  %v3450_v21 = vsel %vm1050_vm4, %v1096_v8, %v1097_v9  ;;  %1506 = vperm.xlu0 %2903, %v1502_v17   ;;  %v625_v51 = vrot.slane %v3444_v11, 1  ;;  %v624_v25 = vsel %vm581_vm2, %v622_v1, %v623_v10  ;;  %v1051_v26 = vrot.slane %v3275_v37, 2 }
  0x31   : > { %2700 = vmatprep.mubr.msk.f32.mxu0 %vm632_vm3, %v604_v27  ;;  %v3454_v22 = vsel %vm1050_vm4, %v1097_v9, %v1099_v14  ;;  %v1052_v27 = vrot.slane %v3272_v36, 2  ;;  %v1054_v28 = vrot.slane %v3278_v38, 2  ;;  %v1056_v37 = vrot.slane %v3241_v13, 2 }
  0x32   : > { %2730 = vmatmul.mubr.msk.f32.gmra.mxu1 %vm632_vm3, %v3297_v49  ;;  %v626_v29 = vsel %vm581_vm2, %v623_v10, %v625_v51  ;;  %v1057_v36 = vrot.slane %v3238_v12, 2  ;;  %v1059_v33 = vrot.slane %v3246_v15, 2  ;;  %v1061_v13 = vrot.slane %v3249_v16, 2 }
  0x33   : > { %2732 = vmatprep.mubr.msk.f32.mxu1 %vm632_vm3, %v3328_v5  ;;  %v1053_v32 = vsel %vm1050_vm4, %v1051_v26, %v1052_v27  ;;  %v1055_v38 = vsel %vm1050_vm4, %v1052_v27, %v1054_v28  ;;  %v1062_v12 = vrot.slane %v3255_v19, 2  ;;  %v1064_v15 = vrot.slane %v3269_v35, 2 }
  0x34   : > { %2701 = vmatmul.mubr.msk.f32.gmra.mxu0 %vm632_vm3, %v606_v41  ;;  %1516 = vperm.xlu0 %2903, %v1503_v23   ;;  %v1058_v40 = vsel %vm1050_vm4, %v1056_v37, %v1057_v36  ;;  %v1060_v41 = vsel %vm1050_vm4, %v1057_v36, %v1059_v33  ;;  %v1066_v16 = vrot.slane %v3281_v39, 2  ;;  %v1067_v19 = vrot.slane %v3297_v49, 2 }
  0x35   : > { %2703 = vmatprep.mubr.msk.f32.mxu0 %vm632_vm3, %v609_v43  ;;  %v1063_v42 = vsel %vm1050_vm4, %v1061_v13, %v1062_v12  ;;  %v1065_v43 = vsel %vm1050_vm4, %v1062_v12, %v1064_v15  ;;  %v1069_v35 = vrot.slane %v3321_v3, 2  ;;  %v1071_v39 = vrot.slane %v3328_v5, 2 }
  0x36   : > { %2733 = vmatmul.mubr.msk.f32.gmra.mxu1 %vm632_vm3, %v3325_v4  ;;  %v1068_v46 = vsel %vm1050_vm4, %v1066_v16, %v1067_v19  ;;  %v1072_v49 = vrot.slane %v3325_v4, 2  ;;  %v1074_v47 = vrot.slane %v3343_v2, 2  ;;  %v1076_v3 = vrot.slane %v3352_v20, 2 }
  0x37   : > { %2735 = vmatprep.mubr.msk.f32.mxu1 %vm632_vm3, %v3352_v20  ;;  %v1079_v5 = vrot.slane %v3368_v30, 2  ;;  %v1081_v55 = vrot.slane %v3371_v31, 2  ;;  %v1082_v2 = vrot.slane %v3377_v34, 2  ;;  %v1084_v20 = vrot.slane %v3389_v48, 2 }
  0x38   : > { %2704 = vmatmul.mubr.msk.f32.gmra.mxu0 %vm632_vm3, %v611_v57  ;;  %v1073_v50 = vsel %vm1050_vm4, %v1071_v39, %v1072_v49  ;;  %v1075_v4 = vsel %vm1050_vm4, %v1072_v49, %v1074_v47  ;;  %v1086_v57 = vrot.slane %v3398_v53, 2  ;;  %v1087_v30 = vrot.slane %v3395_v52, 2  ;;  %v3589_v47 = vld [vmem:[%s3977_s4] ss:$0 sm:$0xff] }
  0x39   : > { %2706 = vmatprep.mubr.msk.f32.mxu0 %vm632_vm3, %v614_v61  ;;  %v1083_v56 = vsel %vm1050_vm4, %v1081_v55, %v1082_v2  ;;  %v1091_v59 = vrot.slane %v3423_v62, 2  ;;  %v1092_v48 = vrot.slane %v3429_v63, 2 }
  0x3a   : > { %2736 = vmatmul.mubr.msk.f32.gmra.mxu1 %vm632_vm3, %v3349_v18  ;;  %v1088_v58 = vsel %vm1050_vm4, %v1086_v57, %v1087_v30 }
  0x3b   : > { %2738 = vmatprep.mubr.msk.f32.mxu1 %vm632_vm3, %v3371_v31  ;;  %v1085_v31 = vsel %vm1050_vm4, %v1082_v2, %v1084_v20  ;;  %v1093_v61 = vsel %vm1050_vm4, %v1091_v59, %v1092_v48 }
  0x3c   : > { %2707 = vmatmul.mubr.msk.f32.gmra.mxu0 %vm632_vm3, %v616_v0  ;;  %v3562_v0 = vld [vmem:[%s3978_s5] sm:$0xf] }
  0x3d   : > { %2709 = vmatprep.mubr.msk.f32.mxu0 %vm632_vm3, %v619_v7 }
  0x3e   : > { %2739 = vmatmul.mubr.msk.f32.gmra.mxu1 %vm632_vm3, %v3377_v34  ;;  %v1089_v34 = vrot.slane %v3417_v60, 2 }
  0x3f   : > { %2741 = vmatprep.mubr.msk.f32.mxu1 %vm632_vm3, %v3398_v53  ;;  %v1094_v53 = vrot.slane %v3444_v11, 2 }
  0x40   : > { %2710 = vmatmul.mubr.msk.f32.gmra.mxu0 %vm632_vm3, %v621_v24 }
  0x41   : > { %2712 = vmatprep.mubr.msk.f32.mxu0 %vm632_vm3, %v624_v25  ;;  %v1095_v60 = vsel %vm1050_vm4, %v1092_v48, %v1094_v53 }
  0x42   : > { %2742 = vmatmul.mubr.msk.f32.gmra.mxu1 %vm632_vm3, %v3395_v52  ;;  %v1090_v52 = vsel %vm1050_vm4, %v1087_v30, %v1089_v34 }
  0x43   : > { %2744 = vmatprep.mubr.msk.f32.mxu1 %vm632_vm3, %v3423_v62  ;;  %v2492_v62 = vld [vmem:[%s3978_s5 + $0x4] sm:$0xf] }
  0x44   : > { %2713 = vmatmul.mubr.msk.f32.gmra.mxu0 %vm632_vm3, %v626_v29  ;;  %2782 = vmatprep.subr.msk.mxu1 %vm673_vm0, %v2492_v62 }
  0x45   : > { %2752 = vmatprep.mubr.msk.f32.mxu0 %vm632_vm3, %v1053_v32  ;;  %2783 = vmatpush3.msk.msra.mxu1 %vm673_vm0, %v2492_v62 }
  0x46   : > { %2745 = vmatmul.mubr.msk.f32.gmra.mxu1 %vm632_vm3, %v3429_v63  ;;  %v2527_v63 = vld [vmem:[%s3978_s5 + $0x8] sm:$0xf]  ;;  %2808 = vmatprep.subr.msk.mxu1 %vm673_vm0, %v3562_v0 }
  0x47   : > { %2747 = vmatprep.mubr.msk.f32.mxu1 %vm632_vm3, %v3291_v45  ;;  %v1070_v45 = vsel %vm1050_vm4, %v1067_v19, %v1069_v35  ;;  %2834 = vmatprep.subr.msk.mxu0 %vm673_vm0, %v2527_v63 }
  0x48   : > { %2753 = vmatmul.mubr.msk.f32.vlgmr.msra.gmra.mxu0 %vm632_vm3, %v1055_v38 }
  0x49   : > { %2755 = vmatprep.mubr.msk.f32.mxu0 %vm632_vm3, %v1058_v40  ;;  %2835 = vmatpush3.msk.msra.mxu0 %vm673_vm0, %v2527_v63 }
  0x4a   : > { %2748 = vmatmul.mubr.msk.f32.gmra.mxu1 %vm632_vm3, %v3288_v44  ;;  %v1077_v44 = vrot.slane %v3349_v18, 2 }
  0x4c   : > { %2756 = vmatmul.mubr.msk.f32.gmra.mxu0 %vm632_vm3, %v1060_v41  ;;  %v1078_v54 = vsel %vm1050_vm4, %v1076_v3, %v1077_v44  ;;  %v1080_v18 = vsel %vm1050_vm4, %v1077_v44, %v1079_v5 }
  0x4d   : > { %2758 = vmatprep.mubr.msk.f32.mxu0 %vm632_vm3, %v1063_v42 }
  0x50   : > { %2759 = vmatmul.mubr.msk.f32.gmra.mxu0 %vm632_vm3, %v1065_v43 }
  0x51   : > { %2761 = vmatprep.mubr.msk.f32.mxu0 %vm632_vm3, %v1068_v46 }
  0x54   : > { %2762 = vmatmul.mubr.msk.f32.gmra.mxu0 %vm632_vm3, %v1070_v45 }
  0x55   : > { %2764 = vmatprep.mubr.msk.f32.mxu0 %vm632_vm3, %v1073_v50 }
  0x58   : > { %2765 = vmatmul.mubr.msk.f32.gmra.mxu0 %vm632_vm3, %v1075_v4 }
  0x59   : > { %2767 = vmatprep.mubr.msk.f32.mxu0 %vm632_vm3, %v1078_v54 }
  0x5c   : > { %2768 = vmatmul.mubr.msk.f32.gmra.mxu0 %vm632_vm3, %v1080_v18 }
  0x5d   : > { %2770 = vmatprep.mubr.msk.f32.mxu0 %vm632_vm3, %v1083_v56 }
  0x60   : > { %2771 = vmatmul.mubr.msk.f32.gmra.mxu0 %vm632_vm3, %v1085_v31 }
  0x61   : > { %2773 = vmatprep.mubr.msk.f32.mxu0 %vm632_vm3, %v1088_v58 }
  0x64   : > { %2774 = vmatmul.mubr.msk.f32.gmra.mxu0 %vm632_vm3, %v1090_v52 }
  0x65   : > { %2776 = vmatprep.mubr.msk.f32.mxu0 %vm632_vm3, %v1093_v61 }
  0x68   : > { %2777 = vmatmul.mubr.msk.f32.gmra.mxu0 %vm632_vm3, %v1095_v60 }
  0x69   : > { %2779 = vmatprep.mubr.msk.f32.mxu0 %vm632_vm3, %v3450_v21 }
  0x6c   : > { %2780 = vmatmul.mubr.msk.f32.gmra.mxu0 %vm632_vm3, %v3454_v22 }
  0xe2   : > { %v3566_v7 = vpop.f32.mrf.mxu1 }
  0xe4   : > { %v2690_v6 = vpop.f32.mrf.mxu0  ;;  %v3568_v8 = vpop.f32.mrf.mxu1 }
  0xe6   : > { %v743_v1 = vpop.f32.mrf.mxu0  ;;  %v2722_v10 = vpop.f32.mrf.mxu1 }
  0xe7   : > { %v957_v5 = vadd.f32 %v2722_v10, %v2690_v6 }
  0xe8   : > { %v2693_v9 = vpop.f32.mrf.mxu0  ;;  %v951_v14 = vpop.f32.mrf.mxu1 }
  0xe9   : > { %v952_v56 = vadd.f32 %v951_v14, %v743_v1 }
  0xea   : > { %v753_v11 = vpop.f32.mrf.mxu0  ;;  %v2725_v21 = vpop.f32.mrf.mxu1 }
  0xeb   : > { %v967_v35 = vadd.f32 %v2725_v21, %v2693_v9 }
  0xec   : > { %v2696_v17 = vpop.f32.mrf.mxu0  ;;  %v961_v23 = vpop.f32.mrf.mxu1 }
  0xed   : > { %v962_v45 = vadd.f32 %v961_v23, %v753_v11 }
  0xee   : > { %v763_v22 = vpop.f32.mrf.mxu0  ;;  %v2728_v51 = vpop.f32.mrf.mxu1 }
  0xef   : > { %v977_v3 = vadd.f32 %v2728_v51, %v2696_v17 }
  0xf0   : > { %v2699_v24 = vpop.f32.mrf.mxu0  ;;  %v971_v26 = vpop.f32.mrf.mxu1 }
  0xf1   : > { %v972_v2 = vadd.f32 %v971_v26, %v763_v22 }
  0xf2   : > { %v773_v25 = vpop.f32.mrf.mxu0  ;;  %v2731_v29 = vpop.f32.mrf.mxu1 }
  0xf3   : > { %v987_v34 = vadd.f32 %v2731_v29, %v2699_v24 }
  0xf4   : > { %v2702_v27 = vpop.f32.mrf.mxu0  ;;  %v981_v36 = vpop.f32.mrf.mxu1 }
  0xf5   : > { %v982_v60 = vadd.f32 %v981_v36, %v773_v25 }
  0xf6   : > { %v783_v28 = vpop.f32.mrf.mxu0  ;;  %v2734_v40 = vpop.f32.mrf.mxu1 }
  0xf7   : > { %v997_v1 = vadd.f32 %v2734_v40, %v2702_v27 }
  0xf8   : > { %v3570_v32 = vpop.f32.mrf.mxu0  ;;  %v991_v41 = vpop.f32.mrf.mxu1 }
  0xf9   : > { %v992_v22 = vadd.f32 %v991_v41, %v783_v28 }
  0xfa   : > { %v3572_v37 = vpop.f32.mrf.mxu0  ;;  %v2737_v16 = vpop.f32.mrf.mxu1 }
  0xfc   : > { %v3574_v38 = vpop.f32.mrf.mxu0  ;;  %v1001_v46 = vpop.f32.mrf.mxu1 }
  0xfe   : > { %v3576_v33 = vpop.f32.mrf.mxu0  ;;  %v2740_v44 = vpop.f32.mrf.mxu1 }
 0x100   : > { %v3578_v13 = vpop.f32.mrf.mxu0  ;;  %v1011_v58 = vpop.f32.mrf.mxu1 }
 0x102   : > { %v3580_v12 = vpop.f32.mrf.mxu0  ;;  %v2743_v11 = vpop.f32.mrf.mxu1 }
 0x104   : > { %v3582_v15 = vpop.f32.mrf.mxu0  ;;  %v1021_v36 = vpop.f32.mrf.mxu1 }
 0x106   : > { %v3584_v42 = vpop.f32.mrf.mxu0 }
 0x108   : > { %v2754_v19 = vpop.f32.mrf.mxu0 }
 0x109   : > { %v1310_v57 = vadd.f32 %v2754_v19, %v957_v5  ;;  %v1007_v19 = vadd.f32 %v2737_v16, %v3570_v32  ;;  %v1017_v5 = vadd.f32 %v2740_v44, %v3574_v38 }
 0x10a   : > { %v1210_v43 = vpop.f32.mrf.mxu0 }
 0x10b   : > { %v1309_v52 = vadd.f32 %v1210_v43, %v952_v56  ;;  %v3607_v9 = vadd.f32 %v3589_v47, %v1310_v57  ;;  %v1002_v43 = vadd.f32 %v1001_v46, %v3572_v37  ;;  %v1012_v37 = vadd.f32 %v1011_v58, %v3576_v33 }
 0x10c   : > { %v2757_v39 = vpop.f32.mrf.mxu0 }
 0x10d   : > { %v1312_v49 = vadd.f32 %v2757_v39, %v967_v35  ;;  %v3614_v23 = vadd.f32 %v3589_v47, %v1309_v52  ;;  %v2473_v27 = vmul.f32 -1.442695, %v3607_v9  ;;  %v1027_v52 = vadd.f32 %v2743_v11, %v3578_v13 }
 0x10e   : > { %v1220_v50 = vpop.f32.mrf.mxu0 }
 0x10f   : > { %v3592_v4 = vadd.f32 %v3589_v47, %v1312_v49  ;;  %v1311_v54 = vadd.f32 %v1220_v50, %v962_v45  ;;  %v2472_v39 = vmul.f32 -1.442695, %v3614_v23 }
 0x110   : > { %v2760_v55 = vpop.f32.mrf.mxu0 }
 0x111   : > { %v2475_v18 = vmul.f32 -1.442695, %v3592_v4  ;;  %v1314_v20 = vadd.f32 %v2760_v55, %v977_v3  ;;  %v3596_v30 = vadd.f32 %v3589_v47, %v1311_v54  ;;  %v2746_v54 = vpop.f32.mrf.mxu1 }
 0x112   : > { %v1230_v31 = vpop.f32.mrf.mxu0 }
 0x113   : > { %2904 = vpow2.f32 %v2475_v18  ;;  %v3599_v59 = vadd.f32 %v3589_v47, %v1314_v20  ;;  %v1313_v48 = vadd.f32 %v1230_v31, %v972_v2  ;;  %v2474_v53 = vmul.f32 -1.442695, %v3596_v30  ;;  %v1031_v31 = vpop.f32.mrf.mxu1 }
 0x114   : > { %v2763_v61 = vpop.f32.mrf.mxu0 }
 0x115   : > { %v2477_v62 = vmul.f32 -1.442695, %v3599_v59  ;;  %v3604_v63 = vadd.f32 %v3589_v47, %v1313_v48  ;;  %v1316_v6 = vadd.f32 %v2763_v61, %v987_v34  ;;  %2906 = vpow2.f32 %v2474_v53 }
 0x116   : > { %v1240_v10 = vpop.f32.mrf.mxu0  ;;  %v1022_v53 = vadd.f32 %v1021_v36, %v3580_v12 }
 0x117   : > { %2908 = vpow2.f32 %v2477_v62  ;;  %v2476_v14 = vmul.f32 -1.442695, %v3604_v63  ;;  %v3611_v17 = vadd.f32 %v3589_v47, %v1316_v6  ;;  %v1315_v21 = vadd.f32 %v1240_v10, %v982_v60 }
 0x118   : > { %v2766_v24 = vpop.f32.mrf.mxu0 }
 0x119   : > { %2910 = vpow2.f32 %v2476_v14  ;;  %v2479_v51 = vmul.f32 -1.442695, %v3611_v17  ;;  %v3618_v25 = vadd.f32 %v3589_v47, %v1315_v21  ;;  %v1318_v26 = vadd.f32 %v2766_v24, %v997_v1  ;;  %v2749_v24 = vpop.f32.mrf.mxu1 }
 0x11a   : > { %v1250_v29 = vpop.f32.mrf.mxu0  ;;  %v1037_v14 = vadd.f32 %v2746_v54, %v3582_v15 }
 0x11b   : > { %2912 = vpow2.f32 %v2479_v51  ;;  %v2478_v40 = vmul.f32 -1.442695, %v3618_v25  ;;  %v3623_v28 = vadd.f32 %v3589_v47, %v1318_v26  ;;  %v1317_v41 = vadd.f32 %v1250_v29, %v992_v22 }
 0x11c   : > { %v2769_v35 = vpop.f32.mrf.mxu0 }
 0x11d   : > { %2914 = vpow2.f32 %v2478_v40  ;;  %v2481_v49 = vmul.f32 -1.442695, %v3623_v28  ;;  %v3630_v45 = vadd.f32 %v3589_v47, %v1317_v41  ;;  %v1320_v50 = vadd.f32 %v2769_v35, %v1007_v19 }
 0x11e   : > { %v1260_v3 = vpop.f32.mrf.mxu0  ;;  %2916 = vpow2.f32 %v2473_v27  ;;  %v1032_v41 = vadd.f32 %v1031_v31, %v3584_v42  ;;  %v1047_v19 = vadd.f32 %v2749_v24, %v3566_v7 }
 0x11f   : > { %v2480_v55 = vmul.f32 -1.442695, %v3630_v45  ;;  %v1319_v32 = vadd.f32 %v1260_v3, %v1002_v43  ;;  %2918 = vpow2.f32 %v2481_v49  ;;  %v3636_v46 = vadd.f32 %v3589_v47, %v1320_v50 }
 0x120   : > { %v2905_v16 = vpop.eup %2904  ;;  %v2772_v2 = vpop.f32.mrf.mxu0  ;;  %2920 = vpow2.f32 %v2472_v39 }
 0x121   : > { %v1419_v18 = vadd.f32 1.0, %v2905_v16  ;;  %v3639_v20 = vadd.f32 %v3589_v47, %v1319_v32  ;;  %v1322_v56 = vadd.f32 %v2772_v2, %v1017_v5  ;;  %2922 = vpow2.f32 %v2480_v55  ;;  %v1041_v39 = vpop.f32.mrf.mxu1 }
 0x122   : > { %v2483_v38 = vmul.f32 -1.442695, %v3636_v46  ;;  %v1270_v44 = vpop.f32.mrf.mxu0  ;;  %v2907_v57 = vpop.eup %2906 }
 0x123   : > { %2924 = vrcp.f32 %v1419_v18  ;;  %v2482_v33 = vmul.f32 -1.442695, %v3639_v20  ;;  %v3644_v34 = vadd.f32 %v3589_v47, %v1322_v56  ;;  %v1321_v58 = vadd.f32 %v1270_v44, %v1012_v37 }
 0x124   : > { %v2909_v48 = vpop.eup %2908  ;;  %v1418_v61 = vadd.f32 1.0, %v2907_v57  ;;  %2926 = vpow2.f32 %v2483_v38  ;;  %v2775_v60 = vpop.f32.mrf.mxu0  ;;  %v1042_v37 = vadd.f32 %v1041_v39, %v3568_v8 }
 0x125   : > { %v1421_v62 = vadd.f32 1.0, %v2909_v48  ;;  %2928 = vpow2.f32 %v2482_v33  ;;  %v2485_v6 = vmul.f32 -1.442695, %v3644_v34  ;;  %v3650_v1 = vadd.f32 %v3589_v47, %v1321_v58 }
 0x126   : > { %v2911_v10 = vpop.eup %2910  ;;  %2930 = vrcp.f32 %v1418_v61  ;;  %v1324_v21 = vadd.f32 %v2775_v60, %v1027_v52  ;;  %v1280_v22 = vpop.f32.mrf.mxu0 }
 0x127   : > { %2932 = vrcp.f32 %v1421_v62  ;;  %v1420_v13 = vadd.f32 1.0, %v2911_v10  ;;  %v2484_v12 = vmul.f32 -1.442695, %v3650_v1  ;;  %v1323_v11 = vadd.f32 %v1280_v22, %v1022_v53 }
 0x128   : > { %v2913_v51 = vpop.eup %2912  ;;  %2934 = vpow2.f32 %v2485_v6  ;;  %v3655_v26 = vadd.f32 %v3589_v47, %v1324_v21  ;;  %v2778_v27 = vpop.f32.mrf.mxu0 }
 0x129   : > { %2936 = vrcp.f32 %v1420_v13  ;;  %v1423_v29 = vadd.f32 1.0, %v2913_v51  ;;  %v3658_v36 = vadd.f32 %v3589_v47, %v1323_v11  ;;  %v1326_v15 = vadd.f32 %v2778_v27, %v1037_v14 }
 0x12a   : > { %v2915_v40 = vpop.eup %2914  ;;  %2938 = vpow2.f32 %v2484_v12  ;;  %v2487_v43 = vmul.f32 -1.442695, %v3655_v26  ;;  %v1290_v35 = vpop.f32.mrf.mxu0 }
 0x12b   : > { %2940 = vrcp.f32 %v1423_v29  ;;  %v1422_v49 = vadd.f32 1.0, %v2915_v40  ;;  %v2486_v50 = vmul.f32 -1.442695, %v3658_v36  ;;  %v3665_v3 = vadd.f32 %v3589_v47, %v1326_v15  ;;  %v3667_v5 = vpop.eup %2916 }
 0x12c   : > { %2942 = vpow2.f32 %v2487_v43  ;;  %v1325_v54 = vadd.f32 %v1290_v35, %v1032_v41  ;;  %v2781_v55 = vpop.f32.mrf.mxu0  ;;  %v2919_v42 = vpop.eup %2918 }
 0x12d   : > { %2944 = vrcp.f32 %v1422_v49  ;;  %v2489_v7 = vmul.f32 -1.442695, %v3665_v3  ;;  %v1328_v32 = vadd.f32 %v2781_v55, %v1047_v19  ;;  %v2921_v16 = vpop.eup %2920  ;;  %v1425_v2 = vadd.f32 1.0, %v2919_v42 }
 0x12e   : > { %2946 = vpow2.f32 %v2486_v50  ;;  %v3672_v18 = vadd.f32 %v3589_v47, %v1325_v54  ;;  %v1300_v56 = vpop.f32.mrf.mxu0  ;;  %v2923_v38 = vpop.eup %2922  ;;  %v1416_v29 = vadd.f32 1.0, %v2921_v16  ;;  %v1417_v19 = vadd.f32 1.0, %v3667_v5 }
 0x12f   : > { %2948 = vpow2.f32 %v2489_v7  ;;  %v3675_v44 = vadd.f32 %v3589_v47, %v1328_v32  ;;  %v1424_v31 = vadd.f32 1.0, %v2923_v38  ;;  %v1327_v58 = vadd.f32 %v1300_v56, %v1042_v37 }
 0x130   : > { %v2925_v57 = vpop.eup %2924  ;;  %v2488_v33 = vmul.f32 -1.442695, %v3672_v18  ;;  %2950 = vrcp.f32 %v1425_v2 }
 0x131   : > { %v2927_v48 = vpop.eup %2926  ;;  %2952 = vrcp.f32 %v1424_v31  ;;  %v2491_v53 = vmul.f32 -1.442695, %v3675_v44  ;;  %v3680_v61 = vadd.f32 %v3589_v47, %v1327_v58  ;;  %v3687_v22 = vmul.f32 %v2925_v57, %v3592_v4 }
 0x132   : > { %v2929_v52 = vpop.eup %2928  ;;  %v1427_v8 = vadd.f32 1.0, %v2927_v48  ;;  %2954 = vpow2.f32 %v2488_v33 }
 0x133   : > { %v2931_v60 = vpop.eup %2930  ;;  %v1426_v62 = vadd.f32 1.0, %v2929_v52  ;;  %v2490_v14 = vmul.f32 -1.442695, %v3680_v61  ;;  %v1507_v52 = vpop.permute.xlu0 %1506 }
 0x134   : > { %v2933_v6 = vpop.eup %2932  ;;  %v3683_v10 = vmul.f32 %v2931_v60, %v3596_v30  ;;  %2956 = vrcp.f32 %v1427_v8 }
 0x135   : > { %v2935_v21 = vpop.eup %2934  ;;  %2958 = vrcp.f32 %v1426_v62  ;;  %v3697_v11 = vmul.f32 %v2933_v6, %v3599_v59 }
 0x136   : > { %v2937_v24 = vpop.eup %2936  ;;  %v1429_v13 = vadd.f32 1.0, %v2935_v21  ;;  %2960 = vpow2.f32 %v2491_v53  ;;  %2784 = vmatprep.mubr.msk.f32.mxu1 %vm632_vm3, %v3683_v10 }
 0x137   : > { %v2939_v47 = vpop.eup %2938  ;;  %v3692_v12 = vmul.f32 %v2937_v24, %v3604_v63  ;;  %2962 = vpow2.f32 %v2490_v14  ;;  %2785 = vmatmul.mubr.msk.f32.vlgmr.msra.gmra.mxu1 %vm632_vm3, %v3687_v22  ;;  %v1517_v62 = vpop.permute.xlu0 %1516 }
 0x138   : > { %v2941_v30 = vpop.eup %2940  ;;  %v1428_v4 = vadd.f32 1.0, %v2939_v47  ;;  %2809 = vmatpush3.msk.msra.mxu1 %vm673_vm0, %v3562_v0  ;;  %2964 = vrcp.f32 %v1429_v13 }
 0x139   : > { %v2943_v51 = vpop.eup %2942  ;;  %2787 = vmatprep.mubr.msk.f32.mxu1 %vm632_vm3, %v3692_v12  ;;  %2836 = vmatprep.mubr.msk.f32.mxu0 %vm632_vm3, %v3692_v12  ;;  %v3713_v40 = vmul.f32 %v2941_v30, %v3611_v17 }
 0x13a   : > { %v2945_v63 = vpop.eup %2944  ;;  %2966 = vrcp.f32 %v1428_v4  ;;  %v1431_v27 = vadd.f32 1.0, %v2943_v51  ;;  %2837 = vmatmul.mubr.msk.f32.vlgmr.msra.gmra.mxu0 %vm632_vm3, %v3697_v11 }
 0x13b   : > { %v2947_v59 = vpop.eup %2946  ;;  %v3708_v15 = vmul.f32 %v2945_v63, %v3618_v25  ;;  %2788 = vmatmul.mubr.msk.f32.gmra.mxu1 %vm632_vm3, %v3697_v11 }
 0x13c   : > { %v2949_v0 = vpop.eup %2948  ;;  %v1430_v41 = vadd.f32 1.0, %v2947_v59  ;;  %2968 = vrcp.f32 %v1431_v27 }
 0x13d   : > { %2790 = vmatprep.mubr.msk.f32.mxu1 %vm632_vm3, %v3708_v15  ;;  %2839 = vmatprep.mubr.msk.f32.mxu0 %vm632_vm3, %v3708_v15  ;;  %v2951_v43 = vpop.eup %2950  ;;  %v1433_v25 = vadd.f32 1.0, %v2949_v0 }
 0x13e   : > { %2970 = vrcp.f32 %v1430_v41  ;;  %2840 = vmatmul.mubr.msk.f32.gmra.mxu0 %vm632_vm3, %v3713_v40  ;;  %v2953_v35 = vpop.eup %2952  ;;  %v3728_v50 = vmul.f32 %v2951_v43, %v3623_v28 }
 0x13f   : > { %2972 = vrcp.f32 %v1416_v29  ;;  %2791 = vmatmul.mubr.msk.f32.gmra.mxu1 %vm632_vm3, %v3713_v40  ;;  %v2955_v17 = vpop.eup %2954  ;;  %v3725_v39 = vmul.f32 %v2953_v35, %v3630_v45 }
 0x140   : > { %2974 = vrcp.f32 %v1417_v19  ;;  %v1432_v5 = vadd.f32 1.0, %v2955_v17  ;;  %v3814_v17 = vld [vmem:[%s3979_s6] ss:$0 sm:$0xff] }
 0x141   : > { %v2957_v49 = vpop.eup %2956  ;;  %2976 = vrcp.f32 %v1433_v25  ;;  %2793 = vmatprep.mubr.msk.f32.mxu1 %vm632_vm3, %v3725_v39  ;;  %2842 = vmatprep.mubr.msk.f32.mxu0 %vm632_vm3, %v3725_v39 }
 0x142   : > { %v2959_v54 = vpop.eup %2958  ;;  %2978 = vrcp.f32 %v1432_v5  ;;  %2843 = vmatmul.mubr.msk.f32.gmra.mxu0 %vm632_vm3, %v3728_v50  ;;  %v1487_v7 = vmul.f32 %v2957_v49, %v3636_v46 }
 0x143   : > { %v2961_v55 = vpop.eup %2960  ;;  %v3735_v42 = vmul.f32 %v2959_v54, %v3639_v20  ;;  %2794 = vmatmul.mubr.msk.f32.gmra.mxu1 %vm632_vm3, %v3728_v50 }
 0x144   : > { %v2963_v28 = vpop.eup %2962  ;;  %v1435_v45 = vadd.f32 1.0, %v2961_v55 }
 0x145   : > { %v1434_v32 = vadd.f32 1.0, %v2963_v28  ;;  %2796 = vmatprep.mubr.msk.f32.mxu1 %vm632_vm3, %v3735_v42  ;;  %2845 = vmatprep.mubr.msk.f32.mxu0 %vm632_vm3, %v3735_v42  ;;  %v2965_v20 = vpop.eup %2964 }
 0x146   : > { %2980 = vrcp.f32 %v1435_v45  ;;  %2846 = vmatmul.mubr.msk.f32.gmra.mxu0 %vm632_vm3, %v1487_v7  ;;  %v1489_v2 = vmul.f32 %v2965_v20, %v3644_v34 }
 0x147   : > { %v2967_v16 = vpop.eup %2966  ;;  %2982 = vrcp.f32 %v1434_v32  ;;  %2797 = vmatmul.mubr.msk.f32.gmra.mxu1 %vm632_vm3, %v1487_v7 }
 0x148   : > { %v1488_v37 = vmul.f32 %v2967_v16, %v3650_v1 }
 0x149   : > { %v2969_v46 = vpop.eup %2968 }
 0x14a   : > { %2799 = vmatprep.mubr.msk.f32.mxu1 %vm632_vm3, %v1488_v37  ;;  %2848 = vmatprep.mubr.msk.f32.mxu0 %vm632_vm3, %v1488_v37  ;;  %v1491_v31 = vmul.f32 %v2969_v46, %v3655_v26 }
 0x14b   : > { %v2971_v56 = vpop.eup %2970  ;;  %2800 = vmatmul.mubr.msk.f32.gmra.mxu1 %vm632_vm3, %v1489_v2  ;;  %2849 = vmatmul.mubr.msk.f32.gmra.mxu0 %vm632_vm3, %v1489_v2 }
 0x14c   : > { %v2973_v38 = vpop.eup %2972  ;;  %v1490_v57 = vmul.f32 %v2971_v56, %v3658_v36 }
 0x14d   : > { %v2975_v33 = vpop.eup %2974  ;;  %v1476_v1 = vmul.f32 %v2973_v38, %v3614_v23 }
 0x14e   : > { %2802 = vmatprep.mubr.msk.f32.mxu1 %vm632_vm3, %v1490_v57  ;;  %2851 = vmatprep.mubr.msk.f32.mxu0 %vm632_vm3, %v1490_v57  ;;  %v2977_v34 = vpop.eup %2976  ;;  %v1477_v26 = vmul.f32 %v2975_v33, %v3607_v9 }
 0x14f   : > { %2803 = vmatmul.mubr.msk.f32.gmra.mxu1 %vm632_vm3, %v1491_v31  ;;  %2852 = vmatmul.mubr.msk.f32.gmra.mxu0 %vm632_vm3, %v1491_v31  ;;  %v2979_v58 = vpop.eup %2978  ;;  %v1493_v36 = vmul.f32 %v2977_v34, %v3665_v3  ;;  %v1519_v53 = vmul.f32 %v1507_v52, %v1476_v1 }
 0x150   : > { %v1492_v48 = vmul.f32 %v2979_v58, %v3672_v18  ;;  %v1520_v3 = vmul.f32 %v1507_v52, %v1477_v26 }
 0x152   : > { %2805 = vmatprep.mubr.msk.f32.mxu1 %vm632_vm3, %v1492_v48  ;;  %2854 = vmatprep.mubr.msk.f32.mxu0 %vm632_vm3, %v1492_v48 }
 0x153   : > { %v2981_v8 = vpop.eup %2980  ;;  %2806 = vmatmul.mubr.msk.f32.gmra.mxu1 %vm632_vm3, %v1493_v36  ;;  %2855 = vmatmul.mubr.msk.f32.gmra.mxu0 %vm632_vm3, %v1493_v36 }
 0x154   : > { %v2983_v60 = vpop.eup %2982  ;;  %v1495_v23 = vmul.f32 %v2981_v8, %v3675_v44  ;;  %2810 = vmatprep.mubr.msk.f32.mxu1 %vm632_vm3, %v1519_v53 }
 0x155   : > { %v1494_v18 = vmul.f32 %v2983_v60, %v3680_v61 }
 0x156   : > { %v1538_v6 = vmul.f32 %v1517_v62, %v1495_v23 }
 0x157   : > { %v1537_v9 = vmul.f32 %v1517_v62, %v1494_v18  ;;  %2811 = vmatmul.mubr.msk.f32.vlgmr.msra.gmra.mxu1 %vm632_vm3, %v1520_v3 }
 0x158   : > { %2813 = vmatprep.mubr.msk.f32.mxu1 %vm632_vm3, %v3683_v10 }
 0x159   : > { %2857 = vmatprep.mubr.msk.f32.mxu0 %vm632_vm3, %v1537_v9 }
 0x15a   : > { %2858 = vmatmul.mubr.msk.f32.gmra.mxu0 %vm632_vm3, %v1538_v6 }
 0x15b   : > { %2814 = vmatmul.mubr.msk.f32.gmra.mxu1 %vm632_vm3, %v3687_v22 }
 0x15c   : > { %2816 = vmatprep.mubr.msk.f32.mxu1 %vm632_vm3, %v3692_v12 }
 0x15f   : > { %2817 = vmatmul.mubr.msk.f32.gmra.mxu1 %vm632_vm3, %v3697_v11 }
 0x160   : > { %2819 = vmatprep.mubr.msk.f32.mxu1 %vm632_vm3, %v3708_v15 }
 0x163   : > { %2820 = vmatmul.mubr.msk.f32.gmra.mxu1 %vm632_vm3, %v3713_v40 }
 0x164   : > { %2822 = vmatprep.mubr.msk.f32.mxu1 %vm632_vm3, %v3725_v39 }
 0x167   : > { %2823 = vmatmul.mubr.msk.f32.gmra.mxu1 %vm632_vm3, %v3728_v50 }
 0x168   : > { %2825 = vmatprep.mubr.msk.f32.mxu1 %vm632_vm3, %v3735_v42 }
 0x16b   : > { %2826 = vmatmul.mubr.msk.f32.gmra.mxu1 %vm632_vm3, %v1487_v7 }
 0x16c   : > { %2828 = vmatprep.mubr.msk.f32.mxu1 %vm632_vm3, %v1488_v37 }
 0x16f   : > { %2829 = vmatmul.mubr.msk.f32.gmra.mxu1 %vm632_vm3, %v1489_v2 }
 0x170   : > { %2831 = vmatprep.mubr.msk.f32.mxu1 %vm632_vm3, %v1490_v57 }
 0x173   : > { %2832 = vmatmul.mubr.msk.f32.gmra.mxu1 %vm632_vm3, %v1491_v31 }
 0x1f7   : > { %v2786_v44 = vpop.f32.mrf.mxu1 }
 0x1f9   : > { %v1660_v61 = vpop.f32.mrf.mxu1 }
 0x1fa   : > { %v2838_v21 = vpop.f32.mrf.mxu0 }
 0x1fb   : > { %v2789_v10 = vpop.f32.mrf.mxu1 }
 0x1fc   : > { %v1970_v13 = vpop.f32.mrf.mxu0 }
 0x1fd   : > { %v1670_v14 = vpop.f32.mrf.mxu1 }
 0x1fe   : > { %v2841_v30 = vpop.f32.mrf.mxu0 }
 0x1ff   : > { %v2792_v22 = vpop.f32.mrf.mxu1 }
 0x200   : > { %v1980_v51 = vpop.f32.mrf.mxu0 }
 0x201   : > { %v1680_v24 = vpop.f32.mrf.mxu1 }
 0x202   : > { %v2844_v59 = vpop.f32.mrf.mxu0 }
 0x203   : > { %v2795_v47 = vpop.f32.mrf.mxu1 }
 0x204   : > { %v1990_v0 = vpop.f32.mrf.mxu0 }
 0x205   : > { %v1690_v12 = vpop.f32.mrf.mxu1 }
 0x206   : > { %v2847_v41 = vpop.f32.mrf.mxu0 }
 0x207   : > { %v2798_v11 = vpop.f32.mrf.mxu1 }
 0x208   : > { %v2000_v35 = vpop.f32.mrf.mxu0 }
 0x209   : > { %v3797_v4 = vpop.f32.mrf.mxu1 }
 0x20b   : > { %v3799_v63 = vpop.f32.mrf.mxu1  ;;  %v2850_v28 = vpop.f32.mrf.mxu0 }
 0x20d   : > { %v3801_v27 = vpop.f32.mrf.mxu1  ;;  %v2010_v38 = vpop.f32.mrf.mxu0 }
 0x20f   : > { %v3803_v29 = vpop.f32.mrf.mxu1  ;;  %v2853_v8 = vpop.f32.mrf.mxu0 }
 0x211   : > { %v3805_v15 = vpop.f32.mrf.mxu1 }
 0x213   : > { %v3807_v40 = vpop.f32.mrf.mxu1 }
 0x215   : > { %v3809_v19 = vpop.f32.mrf.mxu1 }
 0x217   : > { %v2812_v43 = vpop.f32.mrf.mxu1 }
 0x218   : > { %v1820_v25 = vadd.f32 %v2812_v43, %v2786_v44 }
 0x219   : > { %v1814_v39 = vpop.f32.mrf.mxu1 }
 0x21a   : > { %v2050_v49 = vadd.f32 %v2838_v21, %v1820_v25  ;;  %v1815_v50 = vadd.f32 %v1814_v39, %v1660_v61 }
 0x21b   : > { %v2815_v5 = vpop.f32.mrf.mxu1 }
 0x21c   : > { %v3817_v54 = vadd.f32 %v3814_v17, %v2050_v49  ;;  %v2049_v55 = vadd.f32 %v1970_v13, %v1815_v50  ;;  %v1830_v42 = vadd.f32 %v2815_v5, %v2789_v10 }
 0x21d   : > { %v1824_v45 = vpop.f32.mrf.mxu1 }
 0x21e   : > { %v2547_v7 = vmul.f32 -1.442695, %v3817_v54  ;;  %v3821_v32 = vadd.f32 %v3814_v17, %v2049_v55  ;;  %v2052_v20 = vadd.f32 %v2841_v30, %v1830_v42  ;;  %v1825_v16 = vadd.f32 %v1824_v45, %v1670_v14  ;;  %v2020_v14 = vpop.f32.mrf.mxu0 }
 0x21f   : > { %v2818_v37 = vpop.f32.mrf.mxu1 }
 0x220   : > { %2984 = vpow2.f32 %v2547_v7  ;;  %v2546_v2 = vmul.f32 -1.442695, %v3821_v32  ;;  %v3825_v46 = vadd.f32 %v3814_v17, %v2052_v20  ;;  %v2051_v56 = vadd.f32 %v1980_v51, %v1825_v16 }
 0x221   : > { %v1840_v57 = vadd.f32 %v2818_v37, %v2792_v22  ;;  %v1834_v31 = vpop.f32.mrf.mxu1 }
 0x222   : > { %2986 = vpow2.f32 %v2546_v2  ;;  %v2549_v33 = vmul.f32 -1.442695, %v3825_v46  ;;  %v3829_v34 = vadd.f32 %v3814_v17, %v2051_v56  ;;  %v1835_v1 = vadd.f32 %v1834_v31, %v1680_v24 }
 0x223   : > { %v2054_v58 = vadd.f32 %v2844_v59, %v1840_v57  ;;  %v2821_v48 = vpop.f32.mrf.mxu1 }
 0x224   : > { %2988 = vpow2.f32 %v2549_v33  ;;  %v2548_v52 = vmul.f32 -1.442695, %v3829_v34  ;;  %v2053_v36 = vadd.f32 %v1990_v0, %v1835_v1  ;;  %v1850_v26 = vadd.f32 %v2821_v48, %v2795_v47  ;;  %v2856_v0 = vpop.f32.mrf.mxu0 }
 0x225   : > { %v3833_v53 = vadd.f32 %v3814_v17, %v2054_v58  ;;  %v1844_v60 = vpop.f32.mrf.mxu1 }
 0x226   : > { %2990 = vpow2.f32 %v2548_v52  ;;  %v3836_v23 = vadd.f32 %v3814_v17, %v2053_v36  ;;  %v2056_v62 = vadd.f32 %v2847_v41, %v1850_v26  ;;  %v1845_v18 = vadd.f32 %v1844_v60, %v1690_v12  ;;  %v2030_v45 = vpop.f32.mrf.mxu0 }
 0x227   : > { %v2551_v3 = vmul.f32 -1.442695, %v3833_v53  ;;  %v2824_v9 = vpop.f32.mrf.mxu1 }
 0x228   : > { %v2550_v6 = vmul.f32 -1.442695, %v3836_v23  ;;  %v3841_v44 = vadd.f32 %v3814_v17, %v2056_v62  ;;  %v2055_v61 = vadd.f32 %v2000_v35, %v1845_v18  ;;  %v1860_v10 = vadd.f32 %v2824_v9, %v2798_v11 }
 0x229   : > { %2992 = vpow2.f32 %v2551_v3  ;;  %v1854_v21 = vpop.f32.mrf.mxu1 }
 0x22a   : > { %2994 = vpow2.f32 %v2550_v6  ;;  %v2553_v22 = vmul.f32 -1.442695, %v3841_v44  ;;  %v3845_v24 = vadd.f32 %v3814_v17, %v2055_v61  ;;  %v2058_v13 = vadd.f32 %v2850_v28, %v1860_v10 }
 0x22b   : > { %v1855_v47 = vadd.f32 %v1854_v21, %v3797_v4  ;;  %v2827_v12 = vpop.f32.mrf.mxu1 }
 0x22c   : > { %2996 = vpow2.f32 %v2553_v22  ;;  %v2552_v30 = vmul.f32 -1.442695, %v3845_v24  ;;  %v3850_v51 = vadd.f32 %v3814_v17, %v2058_v13  ;;  %v1870_v11 = vadd.f32 %v2827_v12, %v3799_v63 }
 0x22d   : > { %v2985_v59 = vpop.eup %2984  ;;  %v2057_v41 = vadd.f32 %v2010_v38, %v1855_v47  ;;  %v1864_v43 = vpop.f32.mrf.mxu1 }
 0x22e   : > { %v2136_v25 = vadd.f32 1.0, %v2985_v59  ;;  %2998 = vpow2.f32 %v2552_v30  ;;  %v2555_v35 = vmul.f32 -1.442695, %v3850_v51  ;;  %v2060_v39 = vadd.f32 %v2853_v8, %v1870_v11  ;;  %v2859_v38 = vpop.f32.mrf.mxu0 }
 0x22f   : > { %v2987_v49 = vpop.eup %2986  ;;  %v3855_v4 = vadd.f32 %v3814_v17, %v2057_v41  ;;  %v1865_v50 = vadd.f32 %v1864_v43, %v3801_v27  ;;  %v2830_v5 = vpop.f32.mrf.mxu1  ;;  %v3048_v43 = vld [vmem:[%s3224_s8 + $0x8] sm:$0xff] }
 0x230   : > { %3000 = vrcp.f32 %v2136_v25  ;;  %v2135_v55 = vadd.f32 1.0, %v2987_v49  ;;  %v3859_v63 = vadd.f32 %v3814_v17, %v2060_v39  ;;  %v1880_v42 = vadd.f32 %v2830_v5, %v3803_v29  ;;  %v2040_v18 = vpop.f32.mrf.mxu0 }
 0x231   : > { %v2989_v28 = vpop.eup %2988  ;;  %3002 = vpow2.f32 %v2555_v35  ;;  %v2554_v7 = vmul.f32 -1.442695, %v3855_v4  ;;  %v2059_v20 = vadd.f32 %v2020_v14, %v1865_v50  ;;  %v1874_v16 = vpop.f32.mrf.mxu1  ;;  %v3049_v50 = vld [vmem:[%s3224_s8] sm:$0xff] }
 0x232   : > { %3004 = vrcp.f32 %v2135_v55  ;;  %v2138_v37 = vadd.f32 1.0, %v2989_v28  ;;  %v2557_v2 = vmul.f32 -1.442695, %v3859_v63  ;;  %v2062_v27 = vadd.f32 %v2856_v0, %v1880_v42 }
 0x233   : > { %v2991_v56 = vpop.eup %2990  ;;  %3006 = vpow2.f32 %v2554_v7  ;;  %v3865_v57 = vadd.f32 %v3814_v17, %v2059_v20  ;;  %v1875_v29 = vadd.f32 %v1874_v16, %v3805_v15  ;;  %v2833_v31 = vpop.f32.mrf.mxu1 }
 0x234   : > { %3008 = vrcp.f32 %v2138_v37  ;;  %v2137_v33 = vadd.f32 1.0, %v2991_v56  ;;  %v3869_v1 = vadd.f32 %v3814_v17, %v2062_v27  ;;  %v1890_v58 = vadd.f32 %v2833_v31, %v3807_v40 }
 0x235   : > { %3010 = vpow2.f32 %v2557_v2  ;;  %v2556_v48 = vmul.f32 -1.442695, %v3865_v57  ;;  %v2061_v52 = vadd.f32 %v2030_v45, %v1875_v29  ;;  %v1884_v36 = vpop.f32.mrf.mxu1 }
 0x236   : > { %v2993_v26 = vpop.eup %2992  ;;  %3012 = vrcp.f32 %v2137_v33  ;;  %v2559_v8 = vmul.f32 -1.442695, %v3869_v1  ;;  %v2064_v60 = vadd.f32 %v2859_v38, %v1890_v58  ;;  %v1885_v15 = vadd.f32 %v1884_v36, %v3809_v19  ;;  %v3052_v58 = vld [vmem:[%s3224_s8 + $0x28] sm:$0xff] }
 0x237   : > { %v2995_v62 = vpop.eup %2994  ;;  %v2140_v3 = vadd.f32 1.0, %v2993_v26  ;;  %3014 = vpow2.f32 %v2556_v48  ;;  %v3876_v9 = vadd.f32 %v3814_v17, %v2061_v52  ;;  %v3053_v26 = vld [vmem:[%s3224_s8 + $0x20] sm:$0xff] }
 0x238   : > { %v2139_v40 = vadd.f32 1.0, %v2995_v62  ;;  %3016 = vpow2.f32 %v2559_v8  ;;  %v3879_v6 = vadd.f32 %v3814_v17, %v2064_v60  ;;  %v2063_v61 = vadd.f32 %v2040_v18, %v1885_v15  ;;  %v3054_v62 = vld [vmem:[%s3224_s8 + $0x38] sm:$0xff] }
 0x239   : > { %v2997_v10 = vpop.eup %2996  ;;  %3018 = vrcp.f32 %v2140_v3  ;;  %v2558_v14 = vmul.f32 -1.442695, %v3876_v9 }
 0x23a   : > { %3020 = vrcp.f32 %v2139_v40  ;;  %v2142_v19 = vadd.f32 1.0, %v2997_v10  ;;  %v2561_v21 = vmul.f32 -1.442695, %v3879_v6  ;;  %v3884_v22 = vadd.f32 %v3814_v17, %v2063_v61 }
 0x23b   : > { %v2999_v13 = vpop.eup %2998  ;;  %3022 = vpow2.f32 %v2558_v14 }
 0x23c   : > { %3024 = vrcp.f32 %v2142_v19  ;;  %v2141_v47 = vadd.f32 1.0, %v2999_v13  ;;  %v2560_v12 = vmul.f32 -1.442695, %v3884_v22 }
 0x23d   : > { %v3001_v30 = vpop.eup %3000  ;;  %3026 = vpow2.f32 %v2561_v21  ;;  %v3056_v21 = vld [vmem:[%s3224_s8 + $0x48] sm:$0xff] }
 0x23e   : > { %v3003_v11 = vpop.eup %3002  ;;  %v2184_v59 = vmul.f32 %v3001_v30, %v3817_v54  ;;  %3028 = vrcp.f32 %v2141_v47 }
 0x23f   : > { %v3005_v0 = vpop.eup %3004  ;;  %v2144_v17 = vadd.f32 1.0, %v3003_v11  ;;  %3030 = vpow2.f32 %v2560_v12  ;;  %v3057_v12 = vld [vmem:[%s3224_s8 + $0x40] sm:$0xff] }
 0x240   : > { %v3007_v41 = vpop.eup %3006  ;;  %v2200_v25 = vadd.f32 %v3048_v43, %v2184_v59  ;;  %v2183_v35 = vmul.f32 %v3005_v0, %v3821_v32  ;;  %v3050_v32 = vld [vmem:[%s3224_s8 + $0x18] sm:$0xff]  ;;  %v3059_v43 = vld [vmem:[%s3224_s8 + $0x50] sm:$0xff] }
 0x241   : > { %v3009_v39 = vpop.eup %3008  ;;  %3032 = vrcp.f32 %v2144_v17  ;;  %v2143_v54 = vadd.f32 1.0, %v3007_v41  ;;  %v3058_v0 = vld [vmem:[%s3224_s8 + $0x58] sm:$0xff] }
 0x242   : > { %v3011_v49 = vpop.eup %3010  ;;  %2216 = vst.msk [vmem:[%s3893_s9 + $0x8] sm:$0xff] %vm632_vm3, %v2200_v25  ;;  %v2199_v5 = vadd.f32 %v3049_v50, %v2183_v35  ;;  %v2186_v55 = vmul.f32 %v3009_v39, %v3825_v46  ;;  %v3051_v46 = vld [vmem:[%s3224_s8 + $0x10] sm:$0xff]  ;;  %v3060_v35 = vld [vmem:[%s3224_s8 + $0x68] sm:$0xff] }
 0x243   : > { %v3013_v42 = vpop.eup %3012  ;;  %3034 = vrcp.f32 %v2143_v54  ;;  %v2146_v28 = vadd.f32 1.0, %v3011_v49 }
 0x244   : > { %v3015_v45 = vpop.eup %3014  ;;  %2215 = vst.msk [vmem:[%s3893_s9] sm:$0xff] %vm632_vm3, %v2199_v5  ;;  %v2202_v7 = vadd.f32 %v3050_v32, %v2186_v55  ;;  %v2185_v20 = vmul.f32 %v3013_v42, %v3829_v34  ;;  %v3062_v55 = vld [vmem:[%s3224_s8 + $0x78] sm:$0xff] }
 0x245   : > { %v3017_v16 = vpop.eup %3016  ;;  %3036 = vrcp.f32 %v2146_v28  ;;  %v2145_v37 = vadd.f32 1.0, %v3015_v45  ;;  %v3063_v45 = vld [vmem:[%s3224_s8 + $0x70] sm:$0xff] }
 0x246   : > { %v3019_v2 = vpop.eup %3018  ;;  %2218 = vst.msk [vmem:[%s3893_s9 + $0x18] sm:$0xff] %vm632_vm3, %v2202_v7  ;;  %v2201_v27 = vadd.f32 %v3051_v46, %v2185_v20  ;;  %v2148_v56 = vadd.f32 1.0, %v3017_v16 }
 0x247   : > { %v3021_v38 = vpop.eup %3020  ;;  %v2188_v29 = vmul.f32 %v3019_v2, %v3833_v53  ;;  %3038 = vrcp.f32 %v2145_v37 }
 0x248   : > { %v3023_v31 = vpop.eup %3022  ;;  %2217 = vst.msk [vmem:[%s3893_s9 + $0x10] sm:$0xff] %vm632_vm3, %v2201_v27  ;;  %v2187_v34 = vmul.f32 %v3021_v38, %v3836_v23  ;;  %3040 = vrcp.f32 %v2148_v56 }
 0x249   : > { %v3025_v33 = vpop.eup %3024  ;;  %v2204_v48 = vadd.f32 %v3052_v58, %v2188_v29  ;;  %v2147_v52 = vadd.f32 1.0, %v3023_v31 }
 0x24a   : > { %v3027_v36 = vpop.eup %3026  ;;  %v2203_v8 = vadd.f32 %v3053_v26, %v2187_v34  ;;  %v2190_v53 = vmul.f32 %v3025_v33, %v3841_v44  ;;  %v3055_v44 = vld [vmem:[%s3224_s8 + $0x30] sm:$0xff] }
 0x24b   : > { %v3029_v60 = vpop.eup %3028  ;;  %2220 = vst.msk [vmem:[%s3893_s9 + $0x28] sm:$0xff] %vm632_vm3, %v2204_v48  ;;  %3042 = vrcp.f32 %v2147_v52  ;;  %v2150_v15 = vadd.f32 1.0, %v3027_v36 }
 0x24c   : > { %v3031_v23 = vpop.eup %3030  ;;  %2219 = vst.msk [vmem:[%s3893_s9 + $0x20] sm:$0xff] %vm632_vm3, %v2203_v8  ;;  %v2206_v18 = vadd.f32 %v3054_v62, %v2190_v53  ;;  %v2189_v3 = vmul.f32 %v3029_v60, %v3845_v24 }
 0x24d   : > { %3044 = vrcp.f32 %v2150_v15  ;;  %v2149_v40 = vadd.f32 1.0, %v3031_v23 }
 0x24e   : > { %v3033_v61 = vpop.eup %3032  ;;  %2222 = vst.msk [vmem:[%s3893_s9 + $0x38] sm:$0xff] %vm632_vm3, %v2206_v18  ;;  %v2205_v10 = vadd.f32 %v3055_v44, %v2189_v3 }
 0x24f   : > { %v2192_v14 = vmul.f32 %v3033_v61, %v3850_v51  ;;  %3046 = vrcp.f32 %v2149_v40 }
 0x250   : > { %v3035_v19 = vpop.eup %3034  ;;  %2221 = vst.msk [vmem:[%s3893_s9 + $0x30] sm:$0xff] %vm632_vm3, %v2205_v10 }
 0x251   : > { %v2208_v24 = vadd.f32 %v3056_v21, %v2192_v14  ;;  %v2191_v13 = vmul.f32 %v3035_v19, %v3855_v4 }
 0x252   : > { %v3037_v47 = vpop.eup %3036 }
 0x253   : > { %2224 = vst.msk [vmem:[%s3893_s9 + $0x48] sm:$0xff] %vm632_vm3, %v2208_v24  ;;  %v2207_v30 = vadd.f32 %v3057_v12, %v2191_v13  ;;  %v2194_v11 = vmul.f32 %v3037_v47, %v3859_v63 }
 0x254   : > { %v3039_v51 = vpop.eup %3038 }
 0x255   : > { %v3041_v59 = vpop.eup %3040  ;;  %2223 = vst.msk [vmem:[%s3893_s9 + $0x40] sm:$0xff] %vm632_vm3, %v2207_v30  ;;  %v2210_v17 = vadd.f32 %v3058_v0, %v2194_v11  ;;  %v2193_v41 = vmul.f32 %v3039_v51, %v3865_v57  ;;  %v3061_v57 = vld [vmem:[%s3224_s8 + $0x60] sm:$0xff] }
 0x256   : > { %v2196_v4 = vmul.f32 %v3041_v59, %v3869_v1 }
 0x257   : > { %2226 = vst.msk [vmem:[%s3893_s9 + $0x58] sm:$0xff] %vm632_vm3, %v2210_v17  ;;  %v2209_v25 = vadd.f32 %v3059_v43, %v2193_v41 }
 0x258   : > { %v3043_v63 = vpop.eup %3042  ;;  %v2212_v39 = vadd.f32 %v3060_v35, %v2196_v4 }
 0x259   : > { %2225 = vst.msk [vmem:[%s3893_s9 + $0x50] sm:$0xff] %vm632_vm3, %v2209_v25  ;;  %v2195_v54 = vmul.f32 %v3043_v63, %v3876_v9 }
 0x25a   : > { %v3045_v49 = vpop.eup %3044  ;;  %2228 = vst.msk [vmem:[%s3893_s9 + $0x68] sm:$0xff] %vm632_vm3, %v2212_v39 }
 0x25b   : > { %v2211_v1 = vadd.f32 %v3061_v57, %v2195_v54  ;;  %v2198_v50 = vmul.f32 %v3045_v49, %v3879_v6 }
 0x25c   : > { %v3047_v5 = vpop.eup %3046 }
 0x25d   : > { %2227 = vst.msk [vmem:[%s3893_s9 + $0x60] sm:$0xff] %vm632_vm3, %v2211_v1  ;;  %v2214_v42 = vadd.f32 %v3062_v55, %v2198_v50  ;;  %v2197_v28 = vmul.f32 %v3047_v5, %v3884_v22 }
 0x25f   : > { %2230 = vst.msk [vmem:[%s3893_s9 + $0x78] sm:$0xff] %vm632_vm3, %v2214_v42  ;;  %v2213_v32 = vadd.f32 %v3063_v45, %v2197_v28 }
 0x261   : > { %2229 = vst.msk [vmem:[%s3893_s9 + $0x70] sm:$0xff] %vm632_vm3, %v2213_v32 }
 0x262 PF: > { %s17_s28 = sadd.s32 1, %s3102_s28   ;;  %s3982_s24 = smov %s3094_s26 }
 0x263   : > { %p14_p12 = scmp.ge.s32.totalorder %s17_s28, 6   ;;  %s3983_s25 = smov %s3098_s27 }
 0x264   : > { %s3984_s26 = smov %s3987_s29  ;;  %s3985_s27 = smov %s3991_s30 }
 0x265   :  { %16 = sbr.rel (!%p14_p12) target bundleno = 3 (0x3), region = 86 }

</bundles_post_ra>
